<compile_context>
chip_gen: v6e
topology: v6e:2x2x1
jax: 0.10.0
libtpu: 0.0.40
codegen_flags: <defaults>
</compile_context>

<pallas_src>
from functools import partial

import jax
import jax.numpy as jnp
from jax.experimental import pallas as pl
from jax.experimental.pallas import tpu as pltpu


# ----------------------------------------------------------------------------
# Fused whole-network Pallas kernel (one grid step == whole batch)
# ----------------------------------------------------------------------------
def _fused_detector_kernel(p_ref, w1_ref, b1_ref, g_ref, w2_ref, b2_ref,
                           w3_ref, b3_ref, o_ref, *, n_pos_out):
    f32 = jnp.float32
    bf16 = jnp.bfloat16

    # --- stem: Conv3x3/s2 as (c1,k1)@(k1,n*m_mid) matmul + folded-BN bias + SiLU
    b1 = b1_ref[...]                                             # (c1, 1), read once
    x1 = jnp.dot(w1_ref[...], p_ref[...], preferred_element_type=f32) + b1
    x1 = x1 * jax.nn.sigmoid(x1)                                 # (c1, n*m_mid) f32, lane-dense
    x1b = x1.astype(bf16)

    # --- conv2 gather: ONE matmul against the precomputed 0/1 gather matrix ----
    # (stride-2 / pad-1 tap selection + bounds masking are all baked into G).
    xg = jnp.dot(x1b, g_ref[...], preferred_element_type=f32)    # (c1, 9*n*m_out) f32
    # Stack the 9 taps along the contraction dim: rows ordered (tap, channel)
    # to match W2's (i, j, cin) row layout.  Lane-tile-aligned slices + sublane
    # concat (each piece is exactly one f32 vreg row-group).
    x_taps = jnp.concatenate(
        [xg[:, t * n_pos_out:(t + 1) * n_pos_out] for t in range(9)],
        axis=0).astype(bf16)                                     # (9*c1, n*m_out)

    # --- conv2: single K=9*c1 matmul + folded-BN bias + SiLU -------------------
    b2 = b2_ref[...]                                             # (c2, 1)
    x2 = jnp.dot(w2_ref[...], x_taps, preferred_element_type=f32) + b2
    x2 = x2 * jax.nn.sigmoid(x2)                                 # (c2, n*m_out) f32, lane-dense
    x2b = x2.astype(bf16)

    # --- 1x1 detection head; channels-first result -> fully lane-dense store ---
    y = jnp.dot(w3_ref[...], x2b, preferred_element_type=f32) + b3_ref[...]
    o_ref[...] = y.astype(o_ref.dtype)                           # (c_out, n*m_out)


def fused_detector(patches_t, w1t, b1, g_big, w2t, b2, w3t, b3, *, n_pos_out):
    k1, n_pos_mid = patches_t.shape
    c1 = w1t.shape[0]
    c2 = w2t.shape[0]
    c_out = w3t.shape[0]
    kernel = partial(_fused_detector_kernel, n_pos_out=n_pos_out)
    return pl.pallas_call(
        kernel,
        out_shape=jax.ShapeDtypeStruct((c_out, n_pos_out), jnp.float32),
        grid_spec=pltpu.PrefetchScalarGridSpec(
            num_scalar_prefetch=0,
            grid=(1,),                                 # whole batch in one step
            in_specs=[
                pl.BlockSpec((k1, n_pos_mid), lambda i: (0, 0)),        # stem patches (bf16)
                pl.BlockSpec((c1, k1), lambda i: (0, 0)),               # W1^T (BN-folded, bf16)
                pl.BlockSpec((c1, 1), lambda i: (0, 0)),                # b1 (f32)
                pl.BlockSpec((n_pos_mid, 9 * n_pos_out), lambda i: (0, 0)),  # gather matrix (bf16)
                pl.BlockSpec((c2, 9 * c1), lambda i: (0, 0)),           # W2^T (BN-folded, bf16)
                pl.BlockSpec((c2, 1), lambda i: (0, 0)),                # b2 (f32)
                pl.BlockSpec((c_out, c2), lambda i: (0, 0)),            # W3^T (bf16)
                pl.BlockSpec((c_out, 1), lambda i: (0, 0)),             # b3 (f32)
            ],
            out_specs=pl.BlockSpec((c_out, n_pos_out), lambda i: (0, 0)),
        ),
        compiler_params=pltpu.CompilerParams(
            dimension_semantics=("arbitrary",)),
    )(patches_t, w1t, b1, g_big, w2t, b2, w3t, b3)


# ----------------------------------------------------------------------------
# Glue (plain JAX): channels-first stem im2col, conv2 gather matrix, params
# ----------------------------------------------------------------------------
def im2col_cfirst(x_nchw, kh, kw, stride, pad):
    """NCHW image -> (kh*kw*C, N*Ho*Wo) channels-first patch matrix.
    Row order (tap, cin) = (i*kw+j)*C + c; column order (batch, oh, ow)."""
    n, c, h, w = x_nchw.shape
    xp = jnp.pad(x_nchw, ((0, 0), (0, 0), (pad, pad), (pad, pad)))
    ho = (h + 2 * pad - kh) // stride + 1
    wo = (w + 2 * pad - kw) // stride + 1
    cols = []
    for i in range(kh):
        for j in range(kw):
            cols.append(xp[:, :, i:i + stride * ho:stride,
                           j:j + stride * wo:stride])
    patches = jnp.stack(cols, axis=0)                       # (kh*kw, N, C, Ho, Wo)
    patches = jnp.transpose(patches, (0, 2, 1, 3, 4))       # (kh*kw, C, N, Ho, Wo)
    return patches.reshape(kh * kw * c, n * ho * wo)


def make_conv2_gather(n, h_mid, w_mid, h_out, w_out):
    """Precomputed 0/1 gather matrix for conv2 (3x3 / stride 2 / pad 1), hoisted
    out of the kernel.  Shape (n*m_mid, 9*n*m_out); columns ordered (tap, batch,
    output position); out-of-bounds taps are all-zero columns."""
    m_mid = h_mid * w_mid
    m_out = h_out * w_out
    oh = jnp.arange(m_out) // w_out
    ow = jnp.arange(m_out) % w_out
    m_ids = jnp.arange(m_mid)
    taps = []
    for i in range(3):
        for j in range(3):
            u = 2 * oh + (i - 1)
            v = 2 * ow + (j - 1)
            inb = (u >= 0) & (u < h_mid) & (v >= 0) & (v < w_mid)
            src = u * w_mid + v
            taps.append((m_ids[:, None] == src[None, :]) & inb[None, :])
    sel = jnp.stack(taps, axis=0).astype(jnp.float32)       # (9, m_mid, m_out)
    eye = jnp.eye(n, dtype=jnp.float32)                     # batch block-diagonal
    g = jnp.einsum("bB,tmp->bmtBp", eye, sel)               # (n, m_mid, 9, n, m_out)
    return g.reshape(n * m_mid, 9 * n * m_out).astype(jnp.bfloat16)


def init_conv_bn_folded(key, kh, kw, cin, cout, eps=1e-3):
    """Conv+BN params with BN scale folded into the weights (one-time).
    Returns (kernel view: transposed bf16 weight + (cout,1) bias,
             reference view: (kh*kw*cin, cout) f32 weight + (cout,) bias)."""
    k1, k2, k3 = jax.random.split(key, 3)
    w = 0.1 * jax.random.normal(k1, (kh, kw, cin, cout), jnp.float32)   # HWIO
    gamma = 1.0 + 0.1 * jax.random.normal(k2, (cout,), jnp.float32)
    beta = 0.1 * jax.random.normal(k3, (cout,), jnp.float32)
    mean = jnp.zeros((cout,), jnp.float32)
    var = jnp.ones((cout,), jnp.float32)
    scale = gamma / jnp.sqrt(var + eps)
    bias = beta - mean * scale
    w2d = w.reshape(kh * kw * cin, cout) * scale[None, :]   # rows = (i, j, cin)
    kern = (jnp.transpose(w2d).astype(jnp.bfloat16), bias.reshape(cout, 1))
    return kern, (w2d, bias)


def init_head(key, cin, cout):
    """1x1 detection head (no lane padding needed: channels live in sublanes)."""
    k1, k2 = jax.random.split(key)
    w = 0.1 * jax.random.normal(k1, (cin, cout), jnp.float32)
    b = 0.1 * jax.random.normal(k2, (cout,), jnp.float32)
    kern = (jnp.transpose(w).astype(jnp.bfloat16), b.reshape(cout, 1))
    return kern, (w, b)


def init_params(key, num_actions=4, c1=8, c2=16):
    k1, k2, k3 = jax.random.split(key, 3)
    stem_k, stem_r = init_conv_bn_folded(k1, 3, 3, 3, c1)
    conv2_k, conv2_r = init_conv_bn_folded(k2, 3, 3, c1, c2)
    head_k, head_r = init_head(k3, c2, 4 + num_actions)
    return {"stem": stem_k, "conv2": conv2_k, "head": head_k,
            "ref": {"stem": stem_r, "conv2": conv2_r, "head": head_r}}


# ----------------------------------------------------------------------------
# Forward pass (mirrors HumanActionModel.forward -> detector(images))
# ----------------------------------------------------------------------------
# TODO(synk): the original module delegates to a full pretrained ultralytics
# YOLOv8 (backbone + neck + NMS post-processing); only a representative
# YOLO-style detection path is implemented here.
def human_action_model_forward(images_nchw, params):
    n, _, h, w = images_nchw.shape
    assert h % 4 == 0 and w % 4 == 0, "spatial dims must be multiples of 4"
    h_mid, w_mid = h // 2, w // 2
    h_out, w_out = h_mid // 2, w_mid // 2
    # TODO(synk): stem patch extraction stays as a tiny 3-channel XLA op in the
    # wrapper (9x HBM inflation is negligible at this size); conv2's gather,
    # all matmuls and SiLU epilogues run in the single fused kernel.
    patches_t = im2col_cfirst(images_nchw, 3, 3, 2, 1).astype(jnp.bfloat16)
    g_big = make_conv2_gather(n, h_mid, w_mid, h_out, w_out)   # constant-folded
    det = fused_detector(patches_t, *params["stem"], g_big, *params["conv2"],
                         *params["head"], n_pos_out=n * h_out * w_out)
    c_out = det.shape[0]
    det = det.reshape(c_out, n, h_out, w_out)
    return jnp.transpose(det, (1, 0, 2, 3))                    # (N, 4+A, H/4, W/4)


# ----------------------------------------------------------------------------
# Pure-JAX reference (same math, bf16 MXU operands mirrored for a tight check)
# ----------------------------------------------------------------------------
def im2col_nhwc(x, kh, kw, stride, pad):
    n, h, w, c = x.shape
    xp = jnp.pad(x, ((0, 0), (pad, pad), (pad, pad), (0, 0)))
    ho = (h + 2 * pad - kh) // stride + 1
    wo = (w + 2 * pad - kw) // stride + 1
    cols = []
    for i in range(kh):
        for j in range(kw):
            cols.append(xp[:, i:i + stride * ho:stride,
                           j:j + stride * wo:stride, :])
    patches = jnp.concatenate(cols, axis=-1)                 # (N, Ho, Wo, kh*kw*C)
    return patches.reshape(n, ho * wo, kh * kw * c), (ho, wo)


def reference_forward(images_nchw, params):
    bf16 = jnp.bfloat16
    x = jnp.transpose(images_nchw, (0, 2, 3, 1))             # NHWC

    def conv_layer(x, w, b, kh, kw, s, pad, act):
        patches, (ho, wo) = im2col_nhwc(x, kh, kw, s, pad)
        y = jnp.dot(patches.reshape(-1, patches.shape[-1]).astype(bf16),
                    w.astype(bf16), preferred_element_type=jnp.float32)
        y = y.reshape(x.shape[0], ho, wo, -1) + b
        if act:
            y = y * jax.nn.sigmoid(y)
        return y

    w1, b1 = params["ref"]["stem"]
    w2, b2 = params["ref"]["conv2"]
    w3, b3 = params["ref"]["head"]
    x = conv_layer(x, w1, b1, 3, 3, 2, 1, True)
    x = conv_layer(x, w2, b2, 3, 3, 2, 1, True)
    x = conv_layer(x, w3, b3, 1, 1, 1, 0, False)
    return jnp.transpose(x, (0, 3, 1, 2))


if __name__ == "__main__":
    key = jax.random.PRNGKey(0)
    k_img, k_par = jax.random.split(key)

    # PyTorch-style NCHW input images: batch=2, 3 channels, 32x32
    images = jax.random.normal(k_img, (2, 3, 32, 32), jnp.float32)
    params = init_params(k_par, num_actions=4)

    out = jax.jit(human_action_model_forward)(images, params)
    out = jax.block_until_ready(out)

    ref = jax.block_until_ready(reference_forward(images, params))
    assert out.shape == (2, 8, 8, 8), out.shape
    assert jnp.allclose(out, ref, atol=5e-3, rtol=5e-3), "mismatch vs reference"

    print("KERNEL_OK")
</pallas_src>

<mosaic_0001>
module attributes {stable_mosaic.version = 11 : i64} {
  func.func @_fused_detector_kernel(%arg0: i32, %arg1: memref<27x512xbf16, #tpu.memory_space<vmem>>, %arg2: memref<8x27xbf16, #tpu.memory_space<vmem>>, %arg3: memref<8x1xf32, #tpu.memory_space<vmem>>, %arg4: memref<512x1152xbf16, #tpu.memory_space<vmem>>, %arg5: memref<16x72xbf16, #tpu.memory_space<vmem>>, %arg6: memref<16x1xf32, #tpu.memory_space<vmem>>, %arg7: memref<8x16xbf16, #tpu.memory_space<vmem>>, %arg8: memref<8x1xf32, #tpu.memory_space<vmem>>, %arg9: memref<8x128xf32, #tpu.memory_space<vmem>>) attributes {dimension_semantics = [#tpu.dimension_semantics<arbitrary>], iteration_bounds = array<i64: 1>, scalar_prefetch = 0 : i64, scratch_operands = 0 : i64, tpu.core_type = #tpu.core_type<tc>, window_params = [{pipeline_mode = #tpu.pipeline_mode<synchronous>, transform_indices = @transform_0, window_bounds = array<i64: 27, 512>}, {pipeline_mode = #tpu.pipeline_mode<synchronous>, transform_indices = @transform_1, window_bounds = array<i64: 8, 27>}, {pipeline_mode = #tpu.pipeline_mode<synchronous>, transform_indices = @transform_2, window_bounds = array<i64: 8, 1>}, {pipeline_mode = #tpu.pipeline_mode<synchronous>, transform_indices = @transform_3, window_bounds = array<i64: 512, 1152>}, {pipeline_mode = #tpu.pipeline_mode<synchronous>, transform_indices = @transform_4, window_bounds = array<i64: 16, 72>}, {pipeline_mode = #tpu.pipeline_mode<synchronous>, transform_indices = @transform_5, window_bounds = array<i64: 16, 1>}, {pipeline_mode = #tpu.pipeline_mode<synchronous>, transform_indices = @transform_6, window_bounds = array<i64: 8, 16>}, {pipeline_mode = #tpu.pipeline_mode<synchronous>, transform_indices = @transform_7, window_bounds = array<i64: 8, 1>}, {pipeline_mode = #tpu.pipeline_mode<synchronous>, transform_indices = @transform_8, window_bounds = array<i64: 8, 128>}]} {
    %c0 = arith.constant 0 : index
    %c0_0 = arith.constant 0 : index
    %0 = vector.load %arg3[%c0, %c0_0] : memref<8x1xf32, #tpu.memory_space<vmem>>, vector<8x1xf32>
    %c0_1 = arith.constant 0 : index
    %c0_2 = arith.constant 0 : index
    %1 = vector.load %arg2[%c0_1, %c0_2] : memref<8x27xbf16, #tpu.memory_space<vmem>>, vector<8x27xbf16>
    %c0_3 = arith.constant 0 : index
    %c0_4 = arith.constant 0 : index
    %2 = vector.load %arg1[%c0_3, %c0_4] : memref<27x512xbf16, #tpu.memory_space<vmem>>, vector<27x512xbf16>
    %cst = arith.constant dense<0.000000e+00> : vector<8x512xf32>
    %3 = tpu.matmul %1, %2, %cst {dimension_numbers = #tpu.dot_dimension_numbers<[1], [0], [0], [1], [0, 0, 1, 1], [], []>} : vector<8x27xbf16>, vector<27x512xbf16>, vector<8x512xf32> -> vector<8x512xf32>
    %4 = vector.broadcast %0 : vector<8x1xf32> to vector<8x512xf32>
    %5 = arith.addf %3, %4 : vector<8x512xf32>
    %6 = arith.negf %5 : vector<8x512xf32>
    %7 = math.exp %6 : vector<8x512xf32>
    %cst_5 = arith.constant 1.000000e+00 : f32
    %8 = vector.broadcast %cst_5 : f32 to vector<8x512xf32>
    %9 = arith.addf %8, %7 : vector<8x512xf32>
    %10 = arith.divf %8, %9 : vector<8x512xf32>
    %11 = arith.mulf %5, %10 : vector<8x512xf32>
    %12 = arith.truncf %11 : vector<8x512xf32> to vector<8x512xbf16>
    %c0_6 = arith.constant 0 : index
    %c0_7 = arith.constant 0 : index
    %13 = vector.load %arg4[%c0_6, %c0_7] : memref<512x1152xbf16, #tpu.memory_space<vmem>>, vector<512x1152xbf16>
    %cst_8 = arith.constant dense<0.000000e+00> : vector<8x1152xf32>
    %14 = tpu.matmul %12, %13, %cst_8 {dimension_numbers = #tpu.dot_dimension_numbers<[1], [0], [0], [1], [0, 0, 1, 1], [], []>} : vector<8x512xbf16>, vector<512x1152xbf16>, vector<8x1152xf32> -> vector<8x1152xf32>
    %15 = vector.extract_strided_slice %14 {offsets = [0, 0], sizes = [8, 128], strides = [1, 1]} : vector<8x1152xf32> to vector<8x128xf32>
    %16 = vector.extract_strided_slice %14 {offsets = [0, 128], sizes = [8, 128], strides = [1, 1]} : vector<8x1152xf32> to vector<8x128xf32>
    %17 = vector.extract_strided_slice %14 {offsets = [0, 256], sizes = [8, 128], strides = [1, 1]} : vector<8x1152xf32> to vector<8x128xf32>
    %18 = vector.extract_strided_slice %14 {offsets = [0, 384], sizes = [8, 128], strides = [1, 1]} : vector<8x1152xf32> to vector<8x128xf32>
    %19 = vector.extract_strided_slice %14 {offsets = [0, 512], sizes = [8, 128], strides = [1, 1]} : vector<8x1152xf32> to vector<8x128xf32>
    %20 = vector.extract_strided_slice %14 {offsets = [0, 640], sizes = [8, 128], strides = [1, 1]} : vector<8x1152xf32> to vector<8x128xf32>
    %21 = vector.extract_strided_slice %14 {offsets = [0, 768], sizes = [8, 128], strides = [1, 1]} : vector<8x1152xf32> to vector<8x128xf32>
    %22 = vector.extract_strided_slice %14 {offsets = [0, 896], sizes = [8, 128], strides = [1, 1]} : vector<8x1152xf32> to vector<8x128xf32>
    %23 = vector.extract_strided_slice %14 {offsets = [0, 1024], sizes = [8, 128], strides = [1, 1]} : vector<8x1152xf32> to vector<8x128xf32>
    %24 = tpu.concatenate %15, %16, %17, %18, %19, %20, %21, %22, %23 in 0 : vector<8x128xf32>, vector<8x128xf32>, vector<8x128xf32>, vector<8x128xf32>, vector<8x128xf32>, vector<8x128xf32>, vector<8x128xf32>, vector<8x128xf32>, vector<8x128xf32> -> vector<72x128xf32>
    %25 = arith.truncf %24 : vector<72x128xf32> to vector<72x128xbf16>
    %c0_9 = arith.constant 0 : index
    %c0_10 = arith.constant 0 : index
    %26 = vector.load %arg6[%c0_9, %c0_10] : memref<16x1xf32, #tpu.memory_space<vmem>>, vector<16x1xf32>
    %c0_11 = arith.constant 0 : index
    %c0_12 = arith.constant 0 : index
    %27 = vector.load %arg5[%c0_11, %c0_12] : memref<16x72xbf16, #tpu.memory_space<vmem>>, vector<16x72xbf16>
    %cst_13 = arith.constant dense<0.000000e+00> : vector<16x128xf32>
    %28 = tpu.matmul %27, %25, %cst_13 {dimension_numbers = #tpu.dot_dimension_numbers<[1], [0], [0], [1], [0, 0, 1, 1], [], []>} : vector<16x72xbf16>, vector<72x128xbf16>, vector<16x128xf32> -> vector<16x128xf32>
    %29 = vector.broadcast %26 : vector<16x1xf32> to vector<16x128xf32>
    %30 = arith.addf %28, %29 : vector<16x128xf32>
    %31 = arith.negf %30 : vector<16x128xf32>
    %32 = math.exp %31 : vector<16x128xf32>
    %cst_14 = arith.constant 1.000000e+00 : f32
    %33 = vector.broadcast %cst_14 : f32 to vector<16x128xf32>
    %34 = arith.addf %33, %32 : vector<16x128xf32>
    %35 = arith.divf %33, %34 : vector<16x128xf32>
    %36 = arith.mulf %30, %35 : vector<16x128xf32>
    %37 = arith.truncf %36 : vector<16x128xf32> to vector<16x128xbf16>
    %c0_15 = arith.constant 0 : index
    %c0_16 = arith.constant 0 : index
    %38 = vector.load %arg7[%c0_15, %c0_16] : memref<8x16xbf16, #tpu.memory_space<vmem>>, vector<8x16xbf16>
    %cst_17 = arith.constant dense<0.000000e+00> : vector<8x128xf32>
    %39 = tpu.matmul %38, %37, %cst_17 {dimension_numbers = #tpu.dot_dimension_numbers<[1], [0], [0], [1], [0, 0, 1, 1], [], []>} : vector<8x16xbf16>, vector<16x128xbf16>, vector<8x128xf32> -> vector<8x128xf32>
    %c0_18 = arith.constant 0 : index
    %c0_19 = arith.constant 0 : index
    %40 = vector.load %arg8[%c0_18, %c0_19] : memref<8x1xf32, #tpu.memory_space<vmem>>, vector<8x1xf32>
    %41 = vector.broadcast %40 : vector<8x1xf32> to vector<8x128xf32>
    %42 = arith.addf %39, %41 : vector<8x128xf32>
    %c0_20 = arith.constant 0 : index
    %c0_21 = arith.constant 0 : index
    %43 = vector.load %arg9[%c0_20, %c0_21] : memref<8x128xf32, #tpu.memory_space<vmem>>, vector<8x128xf32>
    tpu.vector_store %arg9[%c0_20, %c0_21], %42 {strides = array<i32>} : memref<8x128xf32, #tpu.memory_space<vmem>>, vector<8x128xf32>,
    return
  }
  func.func @transform_0(%arg0: i32) -> (i32, i32) {
    %c0_i32 = arith.constant 0 : i32
    %c0_i32_0 = arith.constant 0 : i32
    %c0_i32_1 = arith.constant 0 : i32
    return %c0_i32, %c0_i32_0 : i32, i32
  }
  func.func @transform_1(%arg0: i32) -> (i32, i32) {
    %c0_i32 = arith.constant 0 : i32
    %c0_i32_0 = arith.constant 0 : i32
    %c0_i32_1 = arith.constant 0 : i32
    return %c0_i32, %c0_i32_0 : i32, i32
  }
  func.func @transform_2(%arg0: i32) -> (i32, i32) {
    %c0_i32 = arith.constant 0 : i32
    %c0_i32_0 = arith.constant 0 : i32
    %c0_i32_1 = arith.constant 0 : i32
    return %c0_i32, %c0_i32_0 : i32, i32
  }
  func.func @transform_3(%arg0: i32) -> (i32, i32) {
    %c0_i32 = arith.constant 0 : i32
    %c0_i32_0 = arith.constant 0 : i32
    %c0_i32_1 = arith.constant 0 : i32
    return %c0_i32, %c0_i32_0 : i32, i32
  }
  func.func @transform_4(%arg0: i32) -> (i32, i32) {
    %c0_i32 = arith.constant 0 : i32
    %c0_i32_0 = arith.constant 0 : i32
    %c0_i32_1 = arith.constant 0 : i32
    return %c0_i32, %c0_i32_0 : i32, i32
  }
  func.func @transform_5(%arg0: i32) -> (i32, i32) {
    %c0_i32 = arith.constant 0 : i32
    %c0_i32_0 = arith.constant 0 : i32
    %c0_i32_1 = arith.constant 0 : i32
    return %c0_i32, %c0_i32_0 : i32, i32
  }
  func.func @transform_6(%arg0: i32) -> (i32, i32) {
    %c0_i32 = arith.constant 0 : i32
    %c0_i32_0 = arith.constant 0 : i32
    %c0_i32_1 = arith.constant 0 : i32
    return %c0_i32, %c0_i32_0 : i32, i32
  }
  func.func @transform_7(%arg0: i32) -> (i32, i32) {
    %c0_i32 = arith.constant 0 : i32
    %c0_i32_0 = arith.constant 0 : i32
    %c0_i32_1 = arith.constant 0 : i32
    return %c0_i32, %c0_i32_0 : i32, i32
  }
  func.func @transform_8(%arg0: i32) -> (i32, i32) {
    %c0_i32 = arith.constant 0 : i32
    %c0_i32_0 = arith.constant 0 : i32
    %c0_i32_1 = arith.constant 0 : i32
    return %c0_i32, %c0_i32_0 : i32, i32
  }
}

</mosaic_0001>

<bundles_post_ra>
// kernel: human_action_model_forward.1
= control target key start
LH: loop header
LB: loop body
LE: loop exit
PB: predicated region body
PF: predicated region fallthrough
CT: control target
= control target key end

     0   :  { %vm85_vm0 = vcmask 1044480   ;;  %vm86_vm1 = vcmask 1045504   ;;  %v3397_v1 = vmov 0   ;;  %v3398_v2 = vmov 65535   ;;  %s4397_s0 = inlined_call_operand.vmem [shape: bf16[27,512], index: 0, kind: input, shape index: {}]   ;;  %s4398_s2 = inlined_call_operand.vmem [shape: f32[8,1], index: 2, kind: input, shape index: {}]   ;;  %s4399_s5 = inlined_call_operand.vmem [shape: f32[16,1], index: 5, kind: input, shape index: {}]   ;;  %s4400_s3 = inlined_call_operand.vmem [shape: bf16[512,1152], index: 3, kind: input, shape index: {}]   ;;  %s4401_s1 = inlined_call_operand.vmem [shape: bf16[8,27], index: 1, kind: input, shape index: {}]   ;;  %s4402_s4 = inlined_call_operand.vmem [shape: bf16[16,72], index: 4, kind: input, shape index: {}]   ;;  %s4403_s7 = inlined_call_operand.vmem [shape: f32[8,1], index: 7, kind: input, shape index: {}]   ;;  %s4404_s6 = inlined_call_operand.vmem [shape: bf16[8,16], index: 6, kind: input, shape index: {}]   ;;  %s4405_s8 = inlined_call_operand.vmem [shape: f32[8,128], index: 8, kind: output, shape index: {}]  }
   0x1   :  { %v2944_v0 = vld [vmem:[%s4397_s0 + $0x24] ss:$16 sps:$4 sm:$0x3f]   ;;  %133 = vmatprep.mubr.bf16.mxu1 %v3397_v1  ;;  %2942 = vset.pattern.permute.xlu0 %v3397_v1  ;;  %v87_v3 = vsel %vm85_vm0, 4294967295, %v3398_v2  ;;  %v2949_v10 = vld [vmem:[%s4397_s0] ss:$16 sps:$4 sm:$0xff]  }
   0x2   :  { %v2946_v4 = vld [vmem:[%s4397_s0 + $0x20] ss:$16 sps:$4 sm:$0x3f]   ;;  %2943 = vset.pattern.permute.xlu1 %v3397_v1  ;;  %v88_v5 = vsel %vm86_vm1, %v87_v3, 0  ;;  %v2947_v8 = vld [vmem:[%s4397_s0 + $0x4] ss:$16 sps:$4 sm:$0xff]  }
   0x3   :  { %v93_v6 = vand.u32 %v2944_v0, %v88_v5  ;;  %v90_v7 = vand.u32 %v2946_v4, %v88_v5  ;;  %v2952_v9 = vld [vmem:[%s4397_s0 + $0x2c] ss:$16 sps:$4 sm:$0x3f]   ;;  %v2950_v11 = vld [vmem:[%s4397_s0 + $0x28] ss:$16 sps:$4 sm:$0x3f]  }
   0x4   :  { %v30_v12 = vld [vmem:[%s4398_s2] sm:$0xff]  ;;  %v99_v14 = vand.u32 %v2952_v9, %v88_v5  ;;  %v2958_v16 = vld [vmem:[%s4400_s3 + $0x1f8] ss:$36 sps:$4 sm:$0xff]   ;;  %vm81_vm2 = vcmask 220160   ;;  %v96_v19 = vand.u32 %v2950_v11, %v88_v5  ;;  %v2961_v21 = vld [vmem:[%s4400_s3 + $0x1b0] ss:$36 sps:$4 sm:$0xff]  }
   0x5   :  { %113 = vmatprep.subr.bf16.mxu1 %v93_v6  ;;  %v2420_v13 = vld [vmem:[%s4399_s5] sm:$0xff]  ;;  %42 = vperm.xlu0 %2942, %v30_v12   ;;  %v2959_v17 = vld [vmem:[%s4400_s3 + $0x1b4] ss:$36 sps:$4 sm:$0xff]   ;;  %v2955_v20 = vld [vmem:[%s4397_s0 + $0xc] ss:$16 sps:$4 sm:$0xff]   ;;  %vm3400_vm3 = vmmov 0  }
   0x6   :  { %114 = vmatpush1.bf16.msra.mxu1 %v90_v7  ;;  %v2956_v15 = vld [vmem:[%s4400_s3 + $0x1fc] ss:$36 sps:$4 sm:$0xff]   ;;  %v2962_v22 = vld [vmem:[%s4400_s3 + $0x16c] ss:$36 sps:$4 sm:$0xff]   ;;  %v2953_v23 = vld [vmem:[%s4397_s0 + $0x8] ss:$16 sps:$4 sm:$0xff]  }
   0x7   :  { %115 = vmatprep.subr.bf16.mxu1 %v2947_v8  ;;  %2007 = vmatprep.subr.bf16.mxu0 %v2956_v15  ;;  %v31_v18 = vld [vmem:[%s4401_s1] sm:$0xf]  ;;  %v2967_v25 = vld [vmem:[%s4400_s3 + $0x168] ss:$36 sps:$4 sm:$0xff]   ;;  %v2964_v27 = vld [vmem:[%s4400_s3 + $0x678] ss:$36 sps:$4 sm:$0xff]  }
   0x8   :  { %2008 = vmatpush1.bf16.msra.mxu0 %v2958_v16  ;;  %v2966_v24 = vld [vmem:[%s4400_s3 + $0x67c] ss:$36 sps:$4 sm:$0xff]   ;;  %v2968_v26 = vld [vmem:[%s4400_s3 + $0x124] ss:$36 sps:$4 sm:$0xff]   ;;  %v2972_v28 = vld [vmem:[%s4400_s3 + $0x634] ss:$36 sps:$4 sm:$0xff]  }
   0x9   :  { %2426 = vperm.xlu0 %2942, %v2420_v13   ;;  %2009 = vmatprep.subr.bf16.mxu0 %v2959_v17  ;;  %v2973_v29 = vld [vmem:[%s4400_s3 + $0x120] ss:$36 sps:$4 sm:$0xff]   ;;  %v2970_v30 = vld [vmem:[%s4400_s3 + $0x630] ss:$36 sps:$4 sm:$0xff]   ;;  %v2979_v33 = vld [vmem:[%s4400_s3 + $0xd8] ss:$36 sps:$4 sm:$0xff]  }
   0xa   :  { %116 = vmatpush1.bf16.msra.mxu1 %v2949_v10  ;;  %v2974_v31 = vld [vmem:[%s4400_s3 + $0xdc] ss:$36 sps:$4 sm:$0xff]   ;;  %v2978_v32 = vld [vmem:[%s4400_s3 + $0x5ec] ss:$36 sps:$4 sm:$0xff]   ;;  %v2980_v34 = vld [vmem:[%s4400_s3 + $0x94] ss:$36 sps:$4 sm:$0xff]  }
   0xb   :  { %154 = vmatprep.subr.bf16.mxu1 %v99_v14  ;;  %v2976_v35 = vld [vmem:[%s4400_s3 + $0x5e8] ss:$36 sps:$4 sm:$0xff]   ;;  %v2985_v37 = vld [vmem:[%s4400_s3 + $0x90] ss:$36 sps:$4 sm:$0xff]   ;;  %v2982_v38 = vld [vmem:[%s4400_s3 + $0x5a0] ss:$36 sps:$4 sm:$0xff]  }
   0xc   :  { %2010 = vmatpush1.bf16.msra.mxu0 %v2961_v21  ;;  %v2984_v36 = vld [vmem:[%s4400_s3 + $0x5a4] ss:$36 sps:$4 sm:$0xff]   ;;  %v2986_v39 = vld [vmem:[%s4400_s3 + $0x4c] ss:$36 sps:$4 sm:$0xff]   ;;  %v2990_v40 = vld [vmem:[%s4400_s3 + $0x55c] ss:$36 sps:$4 sm:$0xff]  }
   0xd   :  { %2567 = vmatmul.mubr.msk.bf16.vlgmr.msra.gmra.mxu1 %vm81_vm2, %v31_v18  ;;  %2011 = vmatprep.subr.bf16.mxu0 %v2962_v22  ;;  %v2988_v41 = vld [vmem:[%s4400_s3 + $0x558] ss:$36 sps:$4 sm:$0xff]   ;;  %v2991_v42 = vld [vmem:[%s4400_s3 + $0x48] ss:$36 sps:$4 sm:$0xff]   ;;  %v2994_v45 = vld [vmem:[%s4400_s3 + $0x510] ss:$36 sps:$4 sm:$0xff]  }
   0xe   :  { %155 = vmatpush1.bf16.msra.mxu1 %v96_v19  ;;  %174 = vmatprep.mubr.bf16.mxu1 %v3397_v1  ;;  %v2992_v43 = vld [vmem:[%s4400_s3 + $0x4] ss:$36 sps:$4 sm:$0xff]   ;;  %v2996_v44 = vld [vmem:[%s4400_s3 + $0x514] ss:$36 sps:$4 sm:$0xff]   ;;  %v2998_v47 = vld [vmem:[%s4400_s3 + $0x43c] ss:$36 sps:$4 sm:$0xff]  }
   0xf   :  { %156 = vmatprep.subr.bf16.mxu1 %v2955_v20  ;;  %v2997_v46 = vld [vmem:[%s4400_s3] ss:$36 sps:$4 sm:$0xff]   ;;  %v3002_v48 = vld [vmem:[%s4400_s3 + $0x4cc] ss:$36 sps:$4 sm:$0xff]   ;;  %v3003_v50 = vld [vmem:[%s4400_s3 + $0x438] ss:$36 sps:$4 sm:$0xff]  }
  0x10   :  { %2012 = vmatpush1.bf16.msra.mxu0 %v2967_v25  ;;  %v3000_v49 = vld [vmem:[%s4400_s3 + $0x4c8] ss:$36 sps:$4 sm:$0xff]   ;;  %v3004_v51 = vld [vmem:[%s4400_s3 + $0x3f4] ss:$36 sps:$4 sm:$0xff]   ;;  %v3006_v53 = vld [vmem:[%s4400_s3 + $0x480] ss:$36 sps:$4 sm:$0xff]  }
  0x11   :  { %2013 = vmatprep.subr.bf16.mxu0 %v2968_v26  ;;  %v3008_v52 = vld [vmem:[%s4400_s3 + $0x484] ss:$36 sps:$4 sm:$0xff]   ;;  %v3009_v54 = vld [vmem:[%s4400_s3 + $0x3f0] ss:$36 sps:$4 sm:$0xff]   ;;  %v3014_v56 = vld [vmem:[%s4400_s3 + $0x8bc] ss:$36 sps:$4 sm:$0xff]  }
  0x12   :  { %157 = vmatpush1.bf16.msra.mxu1 %v2953_v23  ;;  %v3010_v55 = vld [vmem:[%s4400_s3 + $0x3ac] ss:$36 sps:$4 sm:$0xff]   ;;  %v3012_v57 = vld [vmem:[%s4400_s3 + $0x8b8] ss:$36 sps:$4 sm:$0xff]   ;;  %v3016_v59 = vld [vmem:[%s4400_s3 + $0x364] ss:$36 sps:$4 sm:$0xff]  }
  0x13   :  { %2048 = vmatprep.subr.bf16.mxu1 %v2966_v24  ;;  %v3015_v58 = vld [vmem:[%s4400_s3 + $0x3a8] ss:$36 sps:$4 sm:$0xff]   ;;  %v3020_v60 = vld [vmem:[%s4400_s3 + $0x874] ss:$36 sps:$4 sm:$0xff]   ;;  %v3021_v62 = vld [vmem:[%s4400_s3 + $0x360] ss:$36 sps:$4 sm:$0xff]  }
  0x14   :  { %2014 = vmatpush1.bf16.msra.mxu0 %v2973_v29  ;;  %v3018_v61 = vld [vmem:[%s4400_s3 + $0x870] ss:$36 sps:$4 sm:$0xff]   ;;  %v3022_v63 = vld [vmem:[%s4400_s3 + $0x31c] ss:$36 sps:$4 sm:$0xff]   ;;  %v3024_v1 = vld [vmem:[%s4400_s3 + $0x828] ss:$36 sps:$4 sm:$0xff]  }
  0x15   :  { %2568 = vmatmul.mubr.msk.bf16.vlgmr.msra.gmra.mxu1 %vm81_vm2, %v31_v18  ;;  %2015 = vmatprep.subr.bf16.mxu0 %v2974_v31  ;;  %v3026_v0 = vld [vmem:[%s4400_s3 + $0x82c] ss:$36 sps:$4 sm:$0xff]   ;;  %v3027_v2 = vld [vmem:[%s4400_s3 + $0x318] ss:$36 sps:$4 sm:$0xff]   ;;  %v3032_v4 = vld [vmem:[%s4400_s3 + $0x7e4] ss:$36 sps:$4 sm:$0xff]  }
  0x16   :  { %2049 = vmatpush1.bf16.msra.mxu1 %v2964_v27  ;;  %v3028_v3 = vld [vmem:[%s4400_s3 + $0x2d4] ss:$36 sps:$4 sm:$0xff]   ;;  %v3030_v5 = vld [vmem:[%s4400_s3 + $0x7e0] ss:$36 sps:$4 sm:$0xff]   ;;  %v3034_v7 = vld [vmem:[%s4400_s3 + $0x28c] ss:$36 sps:$4 sm:$0xff]  }
  0x17   :  { %2050 = vmatprep.subr.bf16.mxu1 %v2972_v28  ;;  %v3033_v6 = vld [vmem:[%s4400_s3 + $0x2d0] ss:$36 sps:$4 sm:$0xff]   ;;  %v3038_v8 = vld [vmem:[%s4400_s3 + $0x79c] ss:$36 sps:$4 sm:$0xff]   ;;  %v3039_v10 = vld [vmem:[%s4400_s3 + $0x288] ss:$36 sps:$4 sm:$0xff]  }
  0x18   :  { %2016 = vmatpush1.bf16.msra.mxu0 %v2979_v33  ;;  %v3036_v9 = vld [vmem:[%s4400_s3 + $0x798] ss:$36 sps:$4 sm:$0xff]   ;;  %v3040_v11 = vld [vmem:[%s4400_s3 + $0x244] ss:$36 sps:$4 sm:$0xff]   ;;  %v3042_v13 = vld [vmem:[%s4400_s3 + $0x750] ss:$36 sps:$4 sm:$0xff]  }
  0x19   :  { %2017 = vmatprep.subr.bf16.mxu0 %v2980_v34  ;;  %v3044_v12 = vld [vmem:[%s4400_s3 + $0x754] ss:$36 sps:$4 sm:$0xff]   ;;  %v3045_v14 = vld [vmem:[%s4400_s3 + $0x240] ss:$36 sps:$4 sm:$0xff]   ;;  %v3048_v15 = vld [vmem:[%s4400_s3 + $0x70c] ss:$36 sps:$4 sm:$0xff]  }
  0x1a   :  { %2051 = vmatpush1.bf16.msra.mxu1 %v2970_v30  ;;  %v3051_v16 = vld [vmem:[%s4400_s3 + $0x204] ss:$36 sps:$4 sm:$0xff]   ;;  %vm2443_vm4 = vcmask 1043456   ;;  %vm2439_vm5 = vcmask 588800   ;;  %vm2510_vm6 = vcmask 130048  }
  0x1b   :  { %2052 = vmatprep.subr.bf16.mxu1 %v2978_v32  ;;  %v3046_v17 = vld [vmem:[%s4400_s3 + $0x708] ss:$36 sps:$4 sm:$0xff]   ;;  %v3052_v19 = vld [vmem:[%s4400_s3 + $0x6c0] ss:$36 sps:$4 sm:$0xff]  }
  0x1c   :  { %2018 = vmatpush1.bf16.msra.mxu0 %v2985_v37  ;;  %v3054_v18 = vld [vmem:[%s4400_s3 + $0x6c4] ss:$36 sps:$4 sm:$0xff]  }
  0x1d   :  { %2019 = vmatprep.subr.bf16.mxu0 %v2986_v39  ;;  %v3063_v20 = vld [vmem:[%s4400_s3 + $0x684] ss:$36 sps:$4 sm:$0xff]  }
  0x1e   :  { %2053 = vmatpush1.bf16.msra.mxu1 %v2976_v35 }
  0x1f   :  { %2054 = vmatprep.subr.bf16.mxu1 %v2984_v36 }
  0x20   :  { %2020 = vmatpush1.bf16.msra.mxu0 %v2991_v42 }
  0x21   :  { %2021 = vmatprep.subr.bf16.mxu0 %v2992_v43 }
  0x22   :  { %2055 = vmatpush1.bf16.msra.mxu1 %v2982_v38 }
  0x23   :  { %2056 = vmatprep.subr.bf16.mxu1 %v2990_v40 }
  0x24   :  { %2022 = vmatpush1.bf16.msra.mxu0 %v2997_v46 }
  0x25   :  { %2023 = vmatprep.subr.bf16.mxu0 %v2998_v47 }
  0x26   :  { %2057 = vmatpush1.bf16.msra.mxu1 %v2988_v41 }
  0x27   :  { %2058 = vmatprep.subr.bf16.mxu1 %v2996_v44 }
  0x28   :  { %2024 = vmatpush2.bf16.msra.mxu0 %v3003_v50 }
  0x29   :  { %2025 = vmatprep.subr.bf16.mxu0 %v3004_v51  ;;  %v3049_v51 = vld [vmem:[%s4400_s3 + $0x200] ss:$36 sps:$4 sm:$0xff]  }
  0x2a   :  { %2059 = vmatpush1.bf16.msra.mxu1 %v2994_v45 }
  0x2b   :  { %2060 = vmatprep.subr.bf16.mxu1 %v3002_v48 }
  0x2c   :  { %2026 = vmatpush2.bf16.msra.mxu0 %v3009_v54 }
  0x2d   :  { %2027 = vmatprep.subr.bf16.mxu0 %v3010_v55  ;;  %v3055_v55 = vld [vmem:[%s4400_s3 + $0x1b8] ss:$36 sps:$4 sm:$0xff]  }
  0x2e   :  { %2061 = vmatpush1.bf16.msra.mxu1 %v3000_v49 }
  0x2f   :  { %2062 = vmatprep.subr.bf16.mxu1 %v3008_v52 }
  0x30   :  { %2028 = vmatpush2.bf16.msra.mxu0 %v3015_v58  ;;  %v3060_v58 = vld [vmem:[%s4400_s3 + $0x174] ss:$36 sps:$4 sm:$0xff]  }
  0x31   :  { %2029 = vmatprep.subr.bf16.mxu0 %v3016_v59 }
  0x32   :  { %2063 = vmatpush1.bf16.msra.mxu1 %v3006_v53  ;;  %v3057_v53 = vld [vmem:[%s4400_s3 + $0x1bc] ss:$36 sps:$4 sm:$0xff]  }
  0x33   :  { %2064 = vmatprep.subr.bf16.mxu1 %v3014_v56 }
  0x34   :  { %2030 = vmatpush2.bf16.msra.mxu0 %v3021_v62  ;;  %v3061_v62 = vld [vmem:[%s4400_s3 + $0x680] ss:$36 sps:$4 sm:$0xff]  }
  0x35   :  { %2031 = vmatprep.subr.bf16.mxu0 %v3022_v63 }
  0x36   :  { %2065 = vmatpush2.bf16.msra.mxu1 %v3012_v57 }
  0x37   :  { %2066 = vmatprep.subr.bf16.mxu1 %v3020_v60 }
  0x38   :  { %2032 = vmatpush2.bf16.msra.mxu0 %v3027_v2  ;;  %v3064_v2 = vld [vmem:[%s4400_s3 + $0x128] ss:$36 sps:$4 sm:$0xff]  }
  0x39   :  { %2033 = vmatprep.subr.bf16.mxu0 %v3028_v3  ;;  %v3067_v3 = vld [vmem:[%s4400_s3 + $0x638] ss:$36 sps:$4 sm:$0xff]  }
  0x3a   :  { %2067 = vmatpush2.bf16.msra.mxu1 %v3018_v61  ;;  %v3058_v61 = vld [vmem:[%s4400_s3 + $0x170] ss:$36 sps:$4 sm:$0xff]  }
  0x3b   :  { %2068 = vmatprep.subr.bf16.mxu1 %v3026_v0  ;;  %v3066_v0 = vld [vmem:[%s4400_s3 + $0x12c] ss:$36 sps:$4 sm:$0xff]  }
  0x3c   :  { %2034 = vmatpush2.bf16.msra.mxu0 %v3033_v6  ;;  %v3070_v6 = vld [vmem:[%s4400_s3 + $0xe0] ss:$36 sps:$4 sm:$0xff]  }
  0x3d   :  { %2035 = vmatprep.subr.bf16.mxu0 %v3034_v7  ;;  %v3073_v7 = vld [vmem:[%s4400_s3 + $0x5f0] ss:$36 sps:$4 sm:$0xff]  }
  0x3e   :  { %2069 = vmatpush2.bf16.msra.mxu1 %v3024_v1  ;;  %v3069_v1 = vld [vmem:[%s4400_s3 + $0x63c] ss:$36 sps:$4 sm:$0xff]  }
  0x3f   :  { %2070 = vmatprep.subr.bf16.mxu1 %v3032_v4  ;;  %v3072_v4 = vld [vmem:[%s4400_s3 + $0xe4] ss:$36 sps:$4 sm:$0xff]  }
  0x40   :  { %2036 = vmatpush2.bf16.msra.mxu0 %v3039_v10  ;;  %v3076_v10 = vld [vmem:[%s4400_s3 + $0x98] ss:$36 sps:$4 sm:$0xff]  }
  0x41   :  { %2037 = vmatprep.subr.bf16.mxu0 %v3040_v11  ;;  %v3079_v11 = vld [vmem:[%s4400_s3 + $0x5a8] ss:$36 sps:$4 sm:$0xff]  }
  0x42   :  { %2071 = vmatpush2.bf16.msra.mxu1 %v3030_v5  ;;  %v3075_v5 = vld [vmem:[%s4400_s3 + $0x5f4] ss:$36 sps:$4 sm:$0xff]  }
  0x43   :  { %2072 = vmatprep.subr.bf16.mxu1 %v3038_v8  ;;  %v3078_v8 = vld [vmem:[%s4400_s3 + $0x9c] ss:$36 sps:$4 sm:$0xff]  }
  0x44   :  { %2038 = vmatpush2.bf16.msra.mxu0 %v3045_v14  ;;  %v3082_v14 = vld [vmem:[%s4400_s3 + $0x50] ss:$36 sps:$4 sm:$0xff]  }
  0x45   :  { %2089 = vmatprep.subr.bf16.mxu0 %v3051_v16  ;;  %v3090_v16 = vld [vmem:[%s4400_s3 + $0xc] ss:$36 sps:$4 sm:$0xff]  }
  0x46   :  { %2073 = vmatpush2.bf16.msra.mxu1 %v3036_v9  ;;  %v3081_v9 = vld [vmem:[%s4400_s3 + $0x5ac] ss:$36 sps:$4 sm:$0xff]  }
  0x47   :  { %2074 = vmatprep.subr.bf16.mxu1 %v3044_v12  ;;  %v3084_v12 = vld [vmem:[%s4400_s3 + $0x54] ss:$36 sps:$4 sm:$0xff]  }
  0x4a   :  { %2075 = vmatpush2.bf16.msra.mxu1 %v3042_v13  ;;  %v3087_v13 = vld [vmem:[%s4400_s3 + $0x564] ss:$36 sps:$4 sm:$0xff]  }
  0x4b   :  { %2076 = vmatprep.subr.bf16.mxu1 %v3048_v15  ;;  %v3085_v15 = vld [vmem:[%s4400_s3 + $0x560] ss:$36 sps:$4 sm:$0xff]  }
  0x4e   :  { %2077 = vmatpush2.bf16.msra.mxu1 %v3046_v17  ;;  %v3093_v17 = vld [vmem:[%s4400_s3 + $0x51c] ss:$36 sps:$4 sm:$0xff]  }
  0x4f   :  { %2078 = vmatprep.subr.bf16.mxu1 %v3054_v18  ;;  %v3088_v18 = vld [vmem:[%s4400_s3 + $0x8] ss:$36 sps:$4 sm:$0xff]  }
  0x52   :  { %2079 = vmatpush2.bf16.msra.mxu1 %v3052_v19  ;;  %v3091_v19 = vld [vmem:[%s4400_s3 + $0x518] ss:$36 sps:$4 sm:$0xff]  }
  0x53   :  { %2130 = vmatprep.subr.bf16.mxu1 %v3063_v20  ;;  %v3096_v20 = vld [vmem:[%s4400_s3 + $0x444] ss:$36 sps:$4 sm:$0xff]  }
  0x80   :  { %v43_v21 = vpop.permute.xlu0 %42 }
  0xcd   :  { %v135_v22 = vpop.f32.mrf.mxu1 }
  0xce   :  { %v136_v23 = vadd.f32 %v135_v22, %v43_v21  ;;  %v3094_v22 = vld [vmem:[%s4400_s3 + $0x440] ss:$36 sps:$4 sm:$0xff]  }
  0xcf   :  { %v137_v24 = vpop.f32.mrf.mxu1 }
  0xd0   :  { %v2569_v25 = vmul.f32 -1.442695, %v136_v23  ;;  %v138_v26 = vadd.f32 %v137_v24, %v43_v21  ;;  %v3102_v24 = vld [vmem:[%s4400_s3 + $0x3fc] ss:$36 sps:$4 sm:$0xff]  }
  0xd1   :  { %v139_v27 = vpop.f32.mrf.mxu1 }
  0xd2   :  { %3373 = vpow2.f32 %v2569_v25  ;;  %v2570_v28 = vmul.f32 -1.442695, %v138_v26  ;;  %v3105_v25 = vld [vmem:[%s4400_s3 + $0x48c] ss:$36 sps:$4 sm:$0xff]  }
  0xd3   :  { %v140_v29 = vpop.f32.mrf.mxu1  ;;  %v3103_v27 = vld [vmem:[%s4400_s3 + $0x488] ss:$36 sps:$4 sm:$0xff]  }
  0xd4   :  { %3375 = vpow2.f32 %v2570_v28  ;;  %v3108_v28 = vld [vmem:[%s4400_s3 + $0x3b4] ss:$36 sps:$4 sm:$0xff]   ;;  %v3111_v29 = vld [vmem:[%s4400_s3 + $0x8c4] ss:$36 sps:$4 sm:$0xff]  }
  0xd5   :  { %v176_v30 = vpop.f32.mrf.mxu1 }
  0xd6   :  { %v177_v31 = vadd.f32 %v176_v30, %v43_v21  ;;  %v3106_v30 = vld [vmem:[%s4400_s3 + $0x3b0] ss:$36 sps:$4 sm:$0xff]  }
  0xd7   :  { %v178_v32 = vpop.f32.mrf.mxu1 }
  0xd8   :  { %v2571_v33 = vmul.f32 -1.442695, %v177_v31  ;;  %v179_v34 = vadd.f32 %v178_v32, %v43_v21  ;;  %v3099_v21 = vld [vmem:[%s4400_s3 + $0x4d4] ss:$36 sps:$4 sm:$0xff]   ;;  %v3114_v32 = vld [vmem:[%s4400_s3 + $0x36c] ss:$36 sps:$4 sm:$0xff]  }
  0xd9   :  { %v180_v35 = vpop.f32.mrf.mxu1 }
  0xda   :  { %3377 = vpow2.f32 %v2571_v33  ;;  %v2572_v36 = vmul.f32 -1.442695, %v179_v34  ;;  %v3117_v33 = vld [vmem:[%s4400_s3 + $0x87c] ss:$36 sps:$4 sm:$0xff]  }
  0xdb   :  { %v181_v37 = vpop.f32.mrf.mxu1  ;;  %v3115_v35 = vld [vmem:[%s4400_s3 + $0x878] ss:$36 sps:$4 sm:$0xff]  }
  0xdc   :  { %3379 = vpow2.f32 %v2572_v36  ;;  %v3120_v36 = vld [vmem:[%s4400_s3 + $0x324] ss:$36 sps:$4 sm:$0xff]   ;;  %v3123_v37 = vld [vmem:[%s4400_s3 + $0x834] ss:$36 sps:$4 sm:$0xff]  }
  0xdf   :  { %v3374_v38 = vpop.eup %3373 }
  0xe0   :  { %v195_v39 = vadd.f32 1.0, %v3374_v38  ;;  %v3118_v38 = vld [vmem:[%s4400_s3 + $0x320] ss:$36 sps:$4 sm:$0xff]  }
  0xe1   :  { %v3376_v40 = vpop.eup %3375 }
  0xe2   :  { %3381 = vrcp.f32 %v195_v39  ;;  %v196_v41 = vadd.f32 1.0, %v3376_v40  ;;  %v3121_v39 = vld [vmem:[%s4400_s3 + $0x830] ss:$36 sps:$4 sm:$0xff]   ;;  %v3126_v40 = vld [vmem:[%s4400_s3 + $0x2dc] ss:$36 sps:$4 sm:$0xff]  }
  0xe4   :  { %3383 = vrcp.f32 %v196_v41  ;;  %v3129_v41 = vld [vmem:[%s4400_s3 + $0x7ec] ss:$36 sps:$4 sm:$0xff]  }
  0xe7   :  { %v3378_v42 = vpop.eup %3377 }
  0xe8   :  { %v197_v43 = vadd.f32 1.0, %v3378_v42  ;;  %v3124_v42 = vld [vmem:[%s4400_s3 + $0x2d8] ss:$36 sps:$4 sm:$0xff]  }
  0xe9   :  { %v3380_v44 = vpop.eup %3379 }
  0xea   :  { %3385 = vrcp.f32 %v197_v43  ;;  %v198_v45 = vadd.f32 1.0, %v3380_v44  ;;  %v3127_v43 = vld [vmem:[%s4400_s3 + $0x7e8] ss:$36 sps:$4 sm:$0xff]   ;;  %v3132_v44 = vld [vmem:[%s4400_s3 + $0x294] ss:$36 sps:$4 sm:$0xff]  }
  0xec   :  { %3387 = vrcp.f32 %v198_v45  ;;  %v3135_v45 = vld [vmem:[%s4400_s3 + $0x7a4] ss:$36 sps:$4 sm:$0xff]  }
  0xef   :  { %v3382_v46 = vpop.eup %3381 }
  0xf0   :  { %v207_v48 = vmul.f32 %v3382_v46, %v136_v23  ;;  %v3097_v23 = vld [vmem:[%s4400_s3 + $0x4d0] ss:$36 sps:$4 sm:$0xff]  }
  0xf1   :  { %v3384_v47 = vpop.eup %3383  ;;  %v3130_v46 = vld [vmem:[%s4400_s3 + $0x290] ss:$36 sps:$4 sm:$0xff]  }
  0xf2   :  { %v208_v49 = vmul.f32 %v3384_v47, %v138_v26  ;;  %v3684_v52 = vpack.c.bf16 %v207_v48, %v207_v48  ;;  %v3100_v26 = vld [vmem:[%s4400_s3 + $0x3f8] ss:$36 sps:$4 sm:$0xff]   ;;  %v3133_v47 = vld [vmem:[%s4400_s3 + $0x7a0] ss:$36 sps:$4 sm:$0xff]   ;;  %v3138_v48 = vld [vmem:[%s4400_s3 + $0x24c] ss:$36 sps:$4 sm:$0xff]  }
  0xf4   :  { %v3679_v50 = vpack.c.bf16 %v208_v49, %v208_v49  ;;  %v3141_v49 = vld [vmem:[%s4400_s3 + $0x75c] ss:$36 sps:$4 sm:$0xff]  }
  0xf6   :  { %2039 = vmatprep.mubr.bf16.mxu0 %v3679_v50 }
  0xf7   :  { %v3386_v54 = vpop.eup %3385  ;;  %2040 = vmatmul.mubr.bf16.vlgmr.msra.gmra.mxu0 %v3684_v52 }
  0xf8   :  { %2090 = vmatpush1.bf16.msra.mxu0 %v3049_v51  ;;  %2121 = vmatprep.mubr.bf16.mxu0 %v3679_v50  ;;  %v209_v57 = vmul.f32 %v3386_v54, %v177_v31  ;;  %v3109_v31 = vld [vmem:[%s4400_s3 + $0x8c0] ss:$36 sps:$4 sm:$0xff]   ;;  %v3136_v51 = vld [vmem:[%s4400_s3 + $0x248] ss:$36 sps:$4 sm:$0xff]   ;;  %v3144_v54 = vld [vmem:[%s4400_s3 + $0x714] ss:$36 sps:$4 sm:$0xff]  }
  0xf9   :  { %v3388_v56 = vpop.eup %3387  ;;  %2091 = vmatprep.subr.bf16.mxu0 %v3057_v53  ;;  %v3139_v53 = vld [vmem:[%s4400_s3 + $0x758] ss:$36 sps:$4 sm:$0xff]  }
  0xfa   :  { %v210_v59 = vmul.f32 %v3388_v56, %v179_v34  ;;  %v3706_v63 = vpack.c.bf16 %v209_v57, %v209_v57  ;;  %v3112_v34 = vld [vmem:[%s4400_s3 + $0x368] ss:$36 sps:$4 sm:$0xff]   ;;  %v3142_v56 = vld [vmem:[%s4400_s3 + $0x710] ss:$36 sps:$4 sm:$0xff]  }
  0xfb   :  { %v3145_v57 = vld [vmem:[%s4400_s3 + $0x208] ss:$36 sps:$4 sm:$0xff]  }
  0xfc   :  { %v3698_v60 = vpack.c.bf16 %v210_v59, %v210_v59  ;;  %2092 = vmatpush1.bf16.msra.mxu0 %v3055_v55  ;;  %v3147_v55 = vld [vmem:[%s4400_s3 + $0x20c] ss:$36 sps:$4 sm:$0xff]   ;;  %v3153_v59 = vld [vmem:[%s4400_s3 + $0x1c4] ss:$36 sps:$4 sm:$0xff]  }
  0xfd   :  { %2093 = vmatprep.subr.bf16.mxu0 %v3060_v58  ;;  %v3150_v58 = vld [vmem:[%s4400_s3 + $0x6cc] ss:$36 sps:$4 sm:$0xff]  }
  0xfe   :  { %2080 = vmatprep.mubr.bf16.mxu1 %v3698_v60 }
  0xff   :  { %2081 = vmatmul.mubr.bf16.vlgmr.msra.gmra.mxu1 %v3706_v63 }
 0x100   :  { %2094 = vmatpush1.bf16.msra.mxu0 %v3058_v61  ;;  %2131 = vmatpush1.bf16.msra.mxu1 %v3061_v62  ;;  %v3148_v61 = vld [vmem:[%s4400_s3 + $0x6c8] ss:$36 sps:$4 sm:$0xff]   ;;  %v3151_v62 = vld [vmem:[%s4400_s3 + $0x1c0] ss:$36 sps:$4 sm:$0xff]  }
 0x101   :  { %2162 = vmatprep.mubr.bf16.mxu1 %v3698_v60  ;;  %2095 = vmatprep.subr.bf16.mxu0 %v3066_v0  ;;  %v3156_v0 = vld [vmem:[%s4400_s3 + $0x17c] ss:$36 sps:$4 sm:$0xff]  }
 0x102   :  { %2132 = vmatprep.subr.bf16.mxu1 %v3069_v1  ;;  %v3159_v1 = vld [vmem:[%s4400_s3 + $0x68c] ss:$36 sps:$4 sm:$0xff]  }
 0x104   :  { %2096 = vmatpush1.bf16.msra.mxu0 %v3064_v2  ;;  %2133 = vmatpush1.bf16.msra.mxu1 %v3067_v3  ;;  %v3154_v2 = vld [vmem:[%s4400_s3 + $0x178] ss:$36 sps:$4 sm:$0xff]   ;;  %v3157_v3 = vld [vmem:[%s4400_s3 + $0x688] ss:$36 sps:$4 sm:$0xff]  }
 0x105   :  { %2097 = vmatprep.subr.bf16.mxu0 %v3072_v4  ;;  %2134 = vmatprep.subr.bf16.mxu1 %v3075_v5  ;;  %v3162_v4 = vld [vmem:[%s4400_s3 + $0x134] ss:$36 sps:$4 sm:$0xff]   ;;  %v3165_v5 = vld [vmem:[%s4400_s3 + $0x644] ss:$36 sps:$4 sm:$0xff]  }
 0x108   :  { %2098 = vmatpush1.bf16.msra.mxu0 %v3070_v6  ;;  %2135 = vmatpush1.bf16.msra.mxu1 %v3073_v7  ;;  %v3160_v6 = vld [vmem:[%s4400_s3 + $0x130] ss:$36 sps:$4 sm:$0xff]   ;;  %v3163_v7 = vld [vmem:[%s4400_s3 + $0x640] ss:$36 sps:$4 sm:$0xff]  }
 0x109   :  { %2099 = vmatprep.subr.bf16.mxu0 %v3078_v8  ;;  %2136 = vmatprep.subr.bf16.mxu1 %v3081_v9  ;;  %v3168_v8 = vld [vmem:[%s4400_s3 + $0xec] ss:$36 sps:$4 sm:$0xff]   ;;  %v3171_v9 = vld [vmem:[%s4400_s3 + $0x5fc] ss:$36 sps:$4 sm:$0xff]  }
 0x10c   :  { %2100 = vmatpush1.bf16.msra.mxu0 %v3076_v10  ;;  %2137 = vmatpush1.bf16.msra.mxu1 %v3079_v11  ;;  %v3166_v10 = vld [vmem:[%s4400_s3 + $0xe8] ss:$36 sps:$4 sm:$0xff]   ;;  %v3169_v11 = vld [vmem:[%s4400_s3 + $0x5f8] ss:$36 sps:$4 sm:$0xff]  }
 0x10d   :  { %2101 = vmatprep.subr.bf16.mxu0 %v3084_v12  ;;  %2138 = vmatprep.subr.bf16.mxu1 %v3087_v13  ;;  %v3174_v12 = vld [vmem:[%s4400_s3 + $0xa4] ss:$36 sps:$4 sm:$0xff]   ;;  %v3177_v13 = vld [vmem:[%s4400_s3 + $0x5b4] ss:$36 sps:$4 sm:$0xff]  }
 0x110   :  { %2102 = vmatpush1.bf16.msra.mxu0 %v3082_v14  ;;  %2139 = vmatpush1.bf16.msra.mxu1 %v3085_v15  ;;  %v3172_v14 = vld [vmem:[%s4400_s3 + $0xa0] ss:$36 sps:$4 sm:$0xff]   ;;  %v3175_v15 = vld [vmem:[%s4400_s3 + $0x5b0] ss:$36 sps:$4 sm:$0xff]  }
 0x111   :  { %2103 = vmatprep.subr.bf16.mxu0 %v3090_v16  ;;  %2140 = vmatprep.subr.bf16.mxu1 %v3093_v17  ;;  %v3180_v16 = vld [vmem:[%s4400_s3 + $0x5c] ss:$36 sps:$4 sm:$0xff]   ;;  %v3183_v17 = vld [vmem:[%s4400_s3 + $0x56c] ss:$36 sps:$4 sm:$0xff]  }
 0x114   :  { %2104 = vmatpush1.bf16.msra.mxu0 %v3088_v18  ;;  %2141 = vmatpush1.bf16.msra.mxu1 %v3091_v19  ;;  %v3178_v18 = vld [vmem:[%s4400_s3 + $0x58] ss:$36 sps:$4 sm:$0xff]   ;;  %v3181_v19 = vld [vmem:[%s4400_s3 + $0x568] ss:$36 sps:$4 sm:$0xff]  }
 0x115   :  { %2105 = vmatprep.subr.bf16.mxu0 %v3096_v20  ;;  %2142 = vmatprep.subr.bf16.mxu1 %v3099_v21  ;;  %v3186_v20 = vld [vmem:[%s4400_s3 + $0x14] ss:$36 sps:$4 sm:$0xff]   ;;  %v3189_v21 = vld [vmem:[%s4400_s3 + $0x524] ss:$36 sps:$4 sm:$0xff]  }
 0x118   :  { %2106 = vmatpush2.bf16.msra.mxu0 %v3094_v22  ;;  %2143 = vmatpush1.bf16.msra.mxu1 %v3097_v23  ;;  %v3184_v22 = vld [vmem:[%s4400_s3 + $0x10] ss:$36 sps:$4 sm:$0xff]   ;;  %v3187_v23 = vld [vmem:[%s4400_s3 + $0x520] ss:$36 sps:$4 sm:$0xff]  }
 0x119   :  { %2107 = vmatprep.subr.bf16.mxu0 %v3102_v24  ;;  %2144 = vmatprep.subr.bf16.mxu1 %v3105_v25  ;;  %v3192_v24 = vld [vmem:[%s4400_s3 + $0x44c] ss:$36 sps:$4 sm:$0xff]   ;;  %v3195_v25 = vld [vmem:[%s4400_s3 + $0x4dc] ss:$36 sps:$4 sm:$0xff]  }
 0x11c   :  { %2108 = vmatpush2.bf16.msra.mxu0 %v3100_v26  ;;  %2145 = vmatpush1.bf16.msra.mxu1 %v3103_v27  ;;  %v3190_v26 = vld [vmem:[%s4400_s3 + $0x448] ss:$36 sps:$4 sm:$0xff]   ;;  %v3193_v27 = vld [vmem:[%s4400_s3 + $0x4d8] ss:$36 sps:$4 sm:$0xff]  }
 0x11d   :  { %2109 = vmatprep.subr.bf16.mxu0 %v3108_v28  ;;  %2146 = vmatprep.subr.bf16.mxu1 %v3111_v29  ;;  %v3198_v28 = vld [vmem:[%s4400_s3 + $0x404] ss:$36 sps:$4 sm:$0xff]   ;;  %v3201_v29 = vld [vmem:[%s4400_s3 + $0x494] ss:$36 sps:$4 sm:$0xff]  }
 0x120   :  { %2110 = vmatpush2.bf16.msra.mxu0 %v3106_v30  ;;  %2147 = vmatpush2.bf16.msra.mxu1 %v3109_v31  ;;  %v3196_v30 = vld [vmem:[%s4400_s3 + $0x400] ss:$36 sps:$4 sm:$0xff]   ;;  %v3199_v31 = vld [vmem:[%s4400_s3 + $0x490] ss:$36 sps:$4 sm:$0xff]  }
 0x121   :  { %2111 = vmatprep.subr.bf16.mxu0 %v3114_v32  ;;  %2148 = vmatprep.subr.bf16.mxu1 %v3117_v33  ;;  %v3204_v32 = vld [vmem:[%s4400_s3 + $0x3bc] ss:$36 sps:$4 sm:$0xff]   ;;  %v3207_v33 = vld [vmem:[%s4400_s3 + $0x8cc] ss:$36 sps:$4 sm:$0xff]  }
 0x124   :  { %2112 = vmatpush2.bf16.msra.mxu0 %v3112_v34  ;;  %2149 = vmatpush2.bf16.msra.mxu1 %v3115_v35  ;;  %v3202_v34 = vld [vmem:[%s4400_s3 + $0x3b8] ss:$36 sps:$4 sm:$0xff]   ;;  %v3205_v35 = vld [vmem:[%s4400_s3 + $0x8c8] ss:$36 sps:$4 sm:$0xff]  }
 0x125   :  { %2113 = vmatprep.subr.bf16.mxu0 %v3120_v36  ;;  %2150 = vmatprep.subr.bf16.mxu1 %v3123_v37  ;;  %v3210_v36 = vld [vmem:[%s4400_s3 + $0x374] ss:$36 sps:$4 sm:$0xff]   ;;  %v3213_v37 = vld [vmem:[%s4400_s3 + $0x884] ss:$36 sps:$4 sm:$0xff]  }
 0x128   :  { %2114 = vmatpush2.bf16.msra.mxu0 %v3118_v38  ;;  %2151 = vmatpush2.bf16.msra.mxu1 %v3121_v39  ;;  %v3208_v38 = vld [vmem:[%s4400_s3 + $0x370] ss:$36 sps:$4 sm:$0xff]   ;;  %v3211_v39 = vld [vmem:[%s4400_s3 + $0x880] ss:$36 sps:$4 sm:$0xff]  }
 0x129   :  { %2115 = vmatprep.subr.bf16.mxu0 %v3126_v40  ;;  %2152 = vmatprep.subr.bf16.mxu1 %v3129_v41  ;;  %v3216_v40 = vld [vmem:[%s4400_s3 + $0x32c] ss:$36 sps:$4 sm:$0xff]   ;;  %v3219_v41 = vld [vmem:[%s4400_s3 + $0x83c] ss:$36 sps:$4 sm:$0xff]  }
 0x12c   :  { %2116 = vmatpush2.bf16.msra.mxu0 %v3124_v42  ;;  %2153 = vmatpush2.bf16.msra.mxu1 %v3127_v43  ;;  %v3214_v42 = vld [vmem:[%s4400_s3 + $0x328] ss:$36 sps:$4 sm:$0xff]   ;;  %v3217_v43 = vld [vmem:[%s4400_s3 + $0x838] ss:$36 sps:$4 sm:$0xff]  }
 0x12d   :  { %2117 = vmatprep.subr.bf16.mxu0 %v3132_v44  ;;  %2154 = vmatprep.subr.bf16.mxu1 %v3135_v45  ;;  %v3222_v44 = vld [vmem:[%s4400_s3 + $0x2e4] ss:$36 sps:$4 sm:$0xff]   ;;  %v3225_v45 = vld [vmem:[%s4400_s3 + $0x7f4] ss:$36 sps:$4 sm:$0xff]  }
 0x130   :  { %2118 = vmatpush2.bf16.msra.mxu0 %v3130_v46  ;;  %2155 = vmatpush2.bf16.msra.mxu1 %v3133_v47  ;;  %v3220_v46 = vld [vmem:[%s4400_s3 + $0x2e0] ss:$36 sps:$4 sm:$0xff]   ;;  %v3223_v47 = vld [vmem:[%s4400_s3 + $0x7f0] ss:$36 sps:$4 sm:$0xff]  }
 0x131   :  { %2119 = vmatprep.subr.bf16.mxu0 %v3138_v48  ;;  %2156 = vmatprep.subr.bf16.mxu1 %v3141_v49  ;;  %v3228_v48 = vld [vmem:[%s4400_s3 + $0x29c] ss:$36 sps:$4 sm:$0xff]   ;;  %v3231_v49 = vld [vmem:[%s4400_s3 + $0x7ac] ss:$36 sps:$4 sm:$0xff]  }
 0x134   :  { %2120 = vmatpush2.bf16.msra.mxu0 %v3136_v51  ;;  %2157 = vmatpush2.bf16.msra.mxu1 %v3139_v53  ;;  %v3226_v51 = vld [vmem:[%s4400_s3 + $0x298] ss:$36 sps:$4 sm:$0xff]   ;;  %v3229_v53 = vld [vmem:[%s4400_s3 + $0x7a8] ss:$36 sps:$4 sm:$0xff]  }
 0x135   :  { %2158 = vmatprep.subr.bf16.mxu1 %v3144_v54  ;;  %2171 = vmatprep.subr.bf16.mxu0 %v3147_v55  ;;  %v3234_v54 = vld [vmem:[%s4400_s3 + $0x254] ss:$36 sps:$4 sm:$0xff]   ;;  %v3237_v55 = vld [vmem:[%s4400_s3 + $0x764] ss:$36 sps:$4 sm:$0xff]  }
 0x137   :  { %2122 = vmatmul.mubr.bf16.vlgmr.msra.gmra.mxu0 %v3684_v52 }
 0x138   :  { %2159 = vmatpush2.bf16.msra.mxu1 %v3142_v56  ;;  %2172 = vmatpush1.bf16.msra.mxu0 %v3145_v57  ;;  %v3232_v56 = vld [vmem:[%s4400_s3 + $0x250] ss:$36 sps:$4 sm:$0xff]   ;;  %v3235_v57 = vld [vmem:[%s4400_s3 + $0x760] ss:$36 sps:$4 sm:$0xff]  }
 0x139   :  { %2203 = vmatprep.mubr.bf16.mxu0 %v3679_v50  ;;  %2160 = vmatprep.subr.bf16.mxu1 %v3150_v58  ;;  %v3240_v58 = vld [vmem:[%s4400_s3 + $0x71c] ss:$36 sps:$4 sm:$0xff]  }
 0x13a   :  { %2173 = vmatprep.subr.bf16.mxu0 %v3153_v59  ;;  %v3243_v59 = vld [vmem:[%s4400_s3 + $0x214] ss:$36 sps:$4 sm:$0xff]  }
 0x13c   :  { %2161 = vmatpush2.bf16.msra.mxu1 %v3148_v61  ;;  %2174 = vmatpush1.bf16.msra.mxu0 %v3151_v62  ;;  %v3238_v61 = vld [vmem:[%s4400_s3 + $0x718] ss:$36 sps:$4 sm:$0xff]   ;;  %v3241_v62 = vld [vmem:[%s4400_s3 + $0x210] ss:$36 sps:$4 sm:$0xff]  }
 0x13d   :  { %2175 = vmatprep.subr.bf16.mxu0 %v3156_v0  ;;  %2212 = vmatprep.subr.bf16.mxu1 %v3159_v1  ;;  %v3246_v0 = vld [vmem:[%s4400_s3 + $0x6d4] ss:$36 sps:$4 sm:$0xff]   ;;  %v3249_v1 = vld [vmem:[%s4400_s3 + $0x1cc] ss:$36 sps:$4 sm:$0xff]  }
 0x13f   :  { %2163 = vmatmul.mubr.bf16.vlgmr.msra.gmra.mxu1 %v3706_v63 }
 0x140   :  { %2176 = vmatpush1.bf16.msra.mxu0 %v3154_v2  ;;  %2213 = vmatpush1.bf16.msra.mxu1 %v3157_v3  ;;  %v3244_v2 = vld [vmem:[%s4400_s3 + $0x6d0] ss:$36 sps:$4 sm:$0xff]   ;;  %v3247_v3 = vld [vmem:[%s4400_s3 + $0x1c8] ss:$36 sps:$4 sm:$0xff]  }
 0x141   :  { %2244 = vmatprep.mubr.bf16.mxu1 %v3698_v60  ;;  %2177 = vmatprep.subr.bf16.mxu0 %v3162_v4  ;;  %v3252_v4 = vld [vmem:[%s4400_s3 + $0x184] ss:$36 sps:$4 sm:$0xff]  }
 0x142   :  { %2214 = vmatprep.subr.bf16.mxu1 %v3165_v5  ;;  %v3255_v5 = vld [vmem:[%s4400_s3 + $0x694] ss:$36 sps:$4 sm:$0xff]  }
 0x144   :  { %2178 = vmatpush1.bf16.msra.mxu0 %v3160_v6  ;;  %2215 = vmatpush1.bf16.msra.mxu1 %v3163_v7  ;;  %v3250_v6 = vld [vmem:[%s4400_s3 + $0x180] ss:$36 sps:$4 sm:$0xff]   ;;  %v3253_v7 = vld [vmem:[%s4400_s3 + $0x690] ss:$36 sps:$4 sm:$0xff]  }
 0x145   :  { %2179 = vmatprep.subr.bf16.mxu0 %v3168_v8  ;;  %2216 = vmatprep.subr.bf16.mxu1 %v3171_v9  ;;  %v3258_v8 = vld [vmem:[%s4400_s3 + $0x13c] ss:$36 sps:$4 sm:$0xff]   ;;  %v3261_v9 = vld [vmem:[%s4400_s3 + $0x64c] ss:$36 sps:$4 sm:$0xff]  }
 0x148   :  { %2180 = vmatpush1.bf16.msra.mxu0 %v3166_v10  ;;  %2217 = vmatpush1.bf16.msra.mxu1 %v3169_v11  ;;  %v3256_v10 = vld [vmem:[%s4400_s3 + $0x138] ss:$36 sps:$4 sm:$0xff]   ;;  %v3259_v11 = vld [vmem:[%s4400_s3 + $0x648] ss:$36 sps:$4 sm:$0xff]  }
 0x149   :  { %2181 = vmatprep.subr.bf16.mxu0 %v3174_v12  ;;  %2218 = vmatprep.subr.bf16.mxu1 %v3177_v13  ;;  %v3264_v12 = vld [vmem:[%s4400_s3 + $0xf4] ss:$36 sps:$4 sm:$0xff]   ;;  %v3267_v13 = vld [vmem:[%s4400_s3 + $0x604] ss:$36 sps:$4 sm:$0xff]  }
 0x14c   :  { %2182 = vmatpush1.bf16.msra.mxu0 %v3172_v14  ;;  %2219 = vmatpush1.bf16.msra.mxu1 %v3175_v15  ;;  %v3262_v14 = vld [vmem:[%s4400_s3 + $0xf0] ss:$36 sps:$4 sm:$0xff]   ;;  %v3265_v15 = vld [vmem:[%s4400_s3 + $0x600] ss:$36 sps:$4 sm:$0xff]  }
 0x14d   :  { %2183 = vmatprep.subr.bf16.mxu0 %v3180_v16  ;;  %2220 = vmatprep.subr.bf16.mxu1 %v3183_v17  ;;  %v3270_v16 = vld [vmem:[%s4400_s3 + $0xac] ss:$36 sps:$4 sm:$0xff]   ;;  %v3273_v17 = vld [vmem:[%s4400_s3 + $0x5bc] ss:$36 sps:$4 sm:$0xff]  }
 0x150   :  { %2184 = vmatpush1.bf16.msra.mxu0 %v3178_v18  ;;  %2221 = vmatpush1.bf16.msra.mxu1 %v3181_v19  ;;  %v3268_v18 = vld [vmem:[%s4400_s3 + $0xa8] ss:$36 sps:$4 sm:$0xff]   ;;  %v3271_v19 = vld [vmem:[%s4400_s3 + $0x5b8] ss:$36 sps:$4 sm:$0xff]  }
 0x151   :  { %2185 = vmatprep.subr.bf16.mxu0 %v3186_v20  ;;  %2222 = vmatprep.subr.bf16.mxu1 %v3189_v21  ;;  %v3276_v20 = vld [vmem:[%s4400_s3 + $0x64] ss:$36 sps:$4 sm:$0xff]   ;;  %v3279_v21 = vld [vmem:[%s4400_s3 + $0x574] ss:$36 sps:$4 sm:$0xff]  }
 0x154   :  { %2186 = vmatpush1.bf16.msra.mxu0 %v3184_v22  ;;  %2223 = vmatpush1.bf16.msra.mxu1 %v3187_v23  ;;  %v3274_v22 = vld [vmem:[%s4400_s3 + $0x60] ss:$36 sps:$4 sm:$0xff]   ;;  %v3277_v23 = vld [vmem:[%s4400_s3 + $0x570] ss:$36 sps:$4 sm:$0xff]  }
 0x155   :  { %2187 = vmatprep.subr.bf16.mxu0 %v3192_v24  ;;  %2224 = vmatprep.subr.bf16.mxu1 %v3195_v25  ;;  %v3282_v24 = vld [vmem:[%s4400_s3 + $0x1c] ss:$36 sps:$4 sm:$0xff]   ;;  %v3285_v25 = vld [vmem:[%s4400_s3 + $0x52c] ss:$36 sps:$4 sm:$0xff]  }
 0x158   :  { %2188 = vmatpush2.bf16.msra.mxu0 %v3190_v26  ;;  %2225 = vmatpush1.bf16.msra.mxu1 %v3193_v27  ;;  %v3280_v26 = vld [vmem:[%s4400_s3 + $0x18] ss:$36 sps:$4 sm:$0xff]   ;;  %v3283_v27 = vld [vmem:[%s4400_s3 + $0x528] ss:$36 sps:$4 sm:$0xff]  }
 0x159   :  { %2189 = vmatprep.subr.bf16.mxu0 %v3198_v28  ;;  %2226 = vmatprep.subr.bf16.mxu1 %v3201_v29  ;;  %v3288_v28 = vld [vmem:[%s4400_s3 + $0x454] ss:$36 sps:$4 sm:$0xff]   ;;  %v3291_v29 = vld [vmem:[%s4400_s3 + $0x4e4] ss:$36 sps:$4 sm:$0xff]  }
 0x15c   :  { %2190 = vmatpush2.bf16.msra.mxu0 %v3196_v30  ;;  %2227 = vmatpush1.bf16.msra.mxu1 %v3199_v31  ;;  %v3286_v30 = vld [vmem:[%s4400_s3 + $0x450] ss:$36 sps:$4 sm:$0xff]   ;;  %v3289_v31 = vld [vmem:[%s4400_s3 + $0x4e0] ss:$36 sps:$4 sm:$0xff]  }
 0x15d   :  { %2191 = vmatprep.subr.bf16.mxu0 %v3204_v32  ;;  %2228 = vmatprep.subr.bf16.mxu1 %v3207_v33  ;;  %v3294_v32 = vld [vmem:[%s4400_s3 + $0x40c] ss:$36 sps:$4 sm:$0xff]   ;;  %v3297_v33 = vld [vmem:[%s4400_s3 + $0x49c] ss:$36 sps:$4 sm:$0xff]  }
 0x160   :  { %2192 = vmatpush2.bf16.msra.mxu0 %v3202_v34  ;;  %2229 = vmatpush2.bf16.msra.mxu1 %v3205_v35  ;;  %v3292_v34 = vld [vmem:[%s4400_s3 + $0x408] ss:$36 sps:$4 sm:$0xff]   ;;  %v3295_v35 = vld [vmem:[%s4400_s3 + $0x498] ss:$36 sps:$4 sm:$0xff]  }
 0x161   :  { %2193 = vmatprep.subr.bf16.mxu0 %v3210_v36  ;;  %2230 = vmatprep.subr.bf16.mxu1 %v3213_v37  ;;  %v3300_v36 = vld [vmem:[%s4400_s3 + $0x3c4] ss:$36 sps:$4 sm:$0xff]   ;;  %v3303_v37 = vld [vmem:[%s4400_s3 + $0x8d4] ss:$36 sps:$4 sm:$0xff]  }
 0x164   :  { %2194 = vmatpush2.bf16.msra.mxu0 %v3208_v38  ;;  %2231 = vmatpush2.bf16.msra.mxu1 %v3211_v39  ;;  %v3298_v38 = vld [vmem:[%s4400_s3 + $0x3c0] ss:$36 sps:$4 sm:$0xff]   ;;  %v3301_v39 = vld [vmem:[%s4400_s3 + $0x8d0] ss:$36 sps:$4 sm:$0xff]  }
 0x165   :  { %2195 = vmatprep.subr.bf16.mxu0 %v3216_v40  ;;  %2232 = vmatprep.subr.bf16.mxu1 %v3219_v41  ;;  %v3306_v40 = vld [vmem:[%s4400_s3 + $0x37c] ss:$36 sps:$4 sm:$0xff]   ;;  %v3309_v41 = vld [vmem:[%s4400_s3 + $0x88c] ss:$36 sps:$4 sm:$0xff]  }
 0x168   :  { %2196 = vmatpush2.bf16.msra.mxu0 %v3214_v42  ;;  %2233 = vmatpush2.bf16.msra.mxu1 %v3217_v43  ;;  %v3304_v42 = vld [vmem:[%s4400_s3 + $0x378] ss:$36 sps:$4 sm:$0xff]   ;;  %v3307_v43 = vld [vmem:[%s4400_s3 + $0x888] ss:$36 sps:$4 sm:$0xff]  }
 0x169   :  { %2197 = vmatprep.subr.bf16.mxu0 %v3222_v44  ;;  %2234 = vmatprep.subr.bf16.mxu1 %v3225_v45  ;;  %v3312_v44 = vld [vmem:[%s4400_s3 + $0x334] ss:$36 sps:$4 sm:$0xff]   ;;  %v3315_v45 = vld [vmem:[%s4400_s3 + $0x844] ss:$36 sps:$4 sm:$0xff]  }
 0x16c   :  { %2198 = vmatpush2.bf16.msra.mxu0 %v3220_v46  ;;  %2235 = vmatpush2.bf16.msra.mxu1 %v3223_v47  ;;  %v3310_v46 = vld [vmem:[%s4400_s3 + $0x330] ss:$36 sps:$4 sm:$0xff]   ;;  %v3313_v47 = vld [vmem:[%s4400_s3 + $0x840] ss:$36 sps:$4 sm:$0xff]  }
 0x16d   :  { %2199 = vmatprep.subr.bf16.mxu0 %v3228_v48  ;;  %2236 = vmatprep.subr.bf16.mxu1 %v3231_v49  ;;  %v3318_v48 = vld [vmem:[%s4400_s3 + $0x2ec] ss:$36 sps:$4 sm:$0xff]   ;;  %v3321_v49 = vld [vmem:[%s4400_s3 + $0x7fc] ss:$36 sps:$4 sm:$0xff]  }
 0x170   :  { %2200 = vmatpush2.bf16.msra.mxu0 %v3226_v51  ;;  %2237 = vmatpush2.bf16.msra.mxu1 %v3229_v53  ;;  %v3316_v51 = vld [vmem:[%s4400_s3 + $0x2e8] ss:$36 sps:$4 sm:$0xff]   ;;  %v3319_v53 = vld [vmem:[%s4400_s3 + $0x7f8] ss:$36 sps:$4 sm:$0xff]  }
 0x171   :  { %2201 = vmatprep.subr.bf16.mxu0 %v3234_v54  ;;  %2238 = vmatprep.subr.bf16.mxu1 %v3237_v55  ;;  %v3324_v54 = vld [vmem:[%s4400_s3 + $0x2a4] ss:$36 sps:$4 sm:$0xff]   ;;  %v3327_v55 = vld [vmem:[%s4400_s3 + $0x7b4] ss:$36 sps:$4 sm:$0xff]  }
 0x174   :  { %2202 = vmatpush2.bf16.msra.mxu0 %v3232_v56  ;;  %2239 = vmatpush2.bf16.msra.mxu1 %v3235_v57  ;;  %v3322_v56 = vld [vmem:[%s4400_s3 + $0x2a0] ss:$36 sps:$4 sm:$0xff]   ;;  %v3325_v57 = vld [vmem:[%s4400_s3 + $0x7b0] ss:$36 sps:$4 sm:$0xff]  }
 0x175   :  { %2240 = vmatprep.subr.bf16.mxu1 %v3240_v58  ;;  %2253 = vmatprep.subr.bf16.mxu0 %v3243_v59  ;;  %v3330_v58 = vld [vmem:[%s4400_s3 + $0x25c] ss:$36 sps:$4 sm:$0xff]   ;;  %v3333_v59 = vld [vmem:[%s4400_s3 + $0x76c] ss:$36 sps:$4 sm:$0xff]  }
 0x177   :  { %2204 = vmatmul.mubr.bf16.vlgmr.msra.gmra.mxu0 %v3684_v52 }
 0x178   :  { %2241 = vmatpush2.bf16.msra.mxu1 %v3238_v61  ;;  %2254 = vmatpush1.bf16.msra.mxu0 %v3241_v62  ;;  %v3328_v61 = vld [vmem:[%s4400_s3 + $0x258] ss:$36 sps:$4 sm:$0xff]   ;;  %v3331_v62 = vld [vmem:[%s4400_s3 + $0x768] ss:$36 sps:$4 sm:$0xff]  }
 0x179   :  { %2285 = vmatprep.mubr.bf16.mxu0 %v3679_v50  ;;  %2242 = vmatprep.subr.bf16.mxu1 %v3246_v0  ;;  %v3336_v0 = vld [vmem:[%s4400_s3 + $0x724] ss:$36 sps:$4 sm:$0xff]  }
 0x17a   :  { %2255 = vmatprep.subr.bf16.mxu0 %v3249_v1  ;;  %v3337_v1 = vld [vmem:[%s4400_s3 + $0x458] ss:$36 sps:$4 sm:$0xff]  }
 0x17c   :  { %2243 = vmatpush2.bf16.msra.mxu1 %v3244_v2  ;;  %2256 = vmatpush1.bf16.msra.mxu0 %v3247_v3  ;;  %v3334_v2 = vld [vmem:[%s4400_s3 + $0x720] ss:$36 sps:$4 sm:$0xff]   ;;  %v3338_v3 = vld [vmem:[%s4400_s3 + $0x218] ss:$36 sps:$4 sm:$0xff]  }
 0x17d   :  { %2257 = vmatprep.subr.bf16.mxu0 %v3252_v4  ;;  %2294 = vmatprep.subr.bf16.mxu1 %v3255_v5  ;;  %v3341_v4 = vld [vmem:[%s4400_s3 + $0x6dc] ss:$36 sps:$4 sm:$0xff]   ;;  %v3342_v5 = vld [vmem:[%s4400_s3 + $0x410] ss:$36 sps:$4 sm:$0xff]  }
 0x17f   :  { %2245 = vmatmul.mubr.bf16.vlgmr.msra.gmra.mxu1 %v3706_v63 }
 0x180   :  { %2258 = vmatpush1.bf16.msra.mxu0 %v3250_v6  ;;  %2295 = vmatpush1.bf16.msra.mxu1 %v3253_v7  ;;  %v3339_v7 = vld [vmem:[%s4400_s3 + $0x6d8] ss:$36 sps:$4 sm:$0xff]  }
 0x181   :  { %2326 = vmatprep.mubr.bf16.mxu1 %v3698_v60  ;;  %2259 = vmatprep.subr.bf16.mxu0 %v3258_v8  ;;  %v3343_v8 = vld [vmem:[%s4400_s3 + $0x1d0] ss:$36 sps:$4 sm:$0xff]  }
 0x182   :  { %2296 = vmatprep.subr.bf16.mxu1 %v3261_v9 }
 0x184   :  { %2260 = vmatpush1.bf16.msra.mxu0 %v3256_v10  ;;  %2297 = vmatpush1.bf16.msra.mxu1 %v3259_v11  ;;  %v3344_v10 = vld [vmem:[%s4400_s3 + $0x3c8] ss:$36 sps:$4 sm:$0xff]   ;;  %v3345_v11 = vld [vmem:[%s4400_s3 + $0x8d8] ss:$36 sps:$4 sm:$0xff]  }
 0x185   :  { %2261 = vmatprep.subr.bf16.mxu0 %v3264_v12  ;;  %2298 = vmatprep.subr.bf16.mxu1 %v3267_v13  ;;  %v3346_v13 = vld [vmem:[%s4400_s3 + $0x188] ss:$36 sps:$4 sm:$0xff]  }
 0x188   :  { %2262 = vmatpush1.bf16.msra.mxu0 %v3262_v14  ;;  %2299 = vmatpush1.bf16.msra.mxu1 %v3265_v15  ;;  %v3348_v15 = vld [vmem:[%s4400_s3 + $0x380] ss:$36 sps:$4 sm:$0xff]  }
 0x189   :  { %2263 = vmatprep.subr.bf16.mxu0 %v3270_v16  ;;  %2300 = vmatprep.subr.bf16.mxu1 %v3273_v17  ;;  %v3349_v16 = vld [vmem:[%s4400_s3 + $0x890] ss:$36 sps:$4 sm:$0xff]  }
 0x18c   :  { %2264 = vmatpush1.bf16.msra.mxu0 %v3268_v18  ;;  %2301 = vmatpush1.bf16.msra.mxu1 %v3271_v19  ;;  %v3350_v19 = vld [vmem:[%s4400_s3 + $0x140] ss:$36 sps:$4 sm:$0xff]  }
 0x18d   :  { %2265 = vmatprep.subr.bf16.mxu0 %v3276_v20  ;;  %2302 = vmatprep.subr.bf16.mxu1 %v3279_v21  ;;  %v3351_v20 = vld [vmem:[%s4400_s3 + $0x650] ss:$36 sps:$4 sm:$0xff]  }
 0x190   :  { %2266 = vmatpush1.bf16.msra.mxu0 %v3274_v22  ;;  %2303 = vmatpush1.bf16.msra.mxu1 %v3277_v23  ;;  %v3352_v22 = vld [vmem:[%s4400_s3 + $0x338] ss:$36 sps:$4 sm:$0xff]   ;;  %v3353_v23 = vld [vmem:[%s4400_s3 + $0x848] ss:$36 sps:$4 sm:$0xff]  }
 0x191   :  { %2267 = vmatprep.subr.bf16.mxu0 %v3282_v24  ;;  %2304 = vmatprep.subr.bf16.mxu1 %v3285_v25 }
 0x194   :  { %2268 = vmatpush1.bf16.msra.mxu0 %v3280_v26  ;;  %2305 = vmatpush1.bf16.msra.mxu1 %v3283_v27  ;;  %v3355_v27 = vld [vmem:[%s4400_s3 + $0x608] ss:$36 sps:$4 sm:$0xff]  }
 0x195   :  { %2269 = vmatprep.subr.bf16.mxu0 %v3288_v28  ;;  %2306 = vmatprep.subr.bf16.mxu1 %v3291_v29  ;;  %v3356_v29 = vld [vmem:[%s4400_s3 + $0x2f0] ss:$36 sps:$4 sm:$0xff]  }
 0x198   :  { %2270 = vmatpush2.bf16.msra.mxu0 %v3286_v30  ;;  %2307 = vmatpush1.bf16.msra.mxu1 %v3289_v31  ;;  %v3357_v30 = vld [vmem:[%s4400_s3 + $0x800] ss:$36 sps:$4 sm:$0xff]   ;;  %v3358_v31 = vld [vmem:[%s4400_s3 + $0xb0] ss:$36 sps:$4 sm:$0xff]  }
 0x199   :  { %2271 = vmatprep.subr.bf16.mxu0 %v3294_v32  ;;  %2308 = vmatprep.subr.bf16.mxu1 %v3297_v33  ;;  %v3359_v32 = vld [vmem:[%s4400_s3 + $0x5c0] ss:$36 sps:$4 sm:$0xff]   ;;  %v3360_v33 = vld [vmem:[%s4400_s3 + $0x2a8] ss:$36 sps:$4 sm:$0xff]  }
 0x19c   :  { %2272 = vmatpush2.bf16.msra.mxu0 %v3292_v34  ;;  %2309 = vmatpush1.bf16.msra.mxu1 %v3295_v35  ;;  %v3361_v34 = vld [vmem:[%s4400_s3 + $0x7b8] ss:$36 sps:$4 sm:$0xff]   ;;  %v3362_v35 = vld [vmem:[%s4400_s3 + $0x68] ss:$36 sps:$4 sm:$0xff]  }
 0x19d   :  { %2273 = vmatprep.subr.bf16.mxu0 %v3300_v36  ;;  %2310 = vmatprep.subr.bf16.mxu1 %v3303_v37  ;;  %v3363_v36 = vld [vmem:[%s4400_s3 + $0x578] ss:$36 sps:$4 sm:$0xff]   ;;  %v3364_v37 = vld [vmem:[%s4400_s3 + $0x260] ss:$36 sps:$4 sm:$0xff]  }
 0x1a0   :  { %2274 = vmatpush2.bf16.msra.mxu0 %v3298_v38  ;;  %2311 = vmatpush2.bf16.msra.mxu1 %v3301_v39  ;;  %v3365_v38 = vld [vmem:[%s4400_s3 + $0x770] ss:$36 sps:$4 sm:$0xff]   ;;  %v3366_v39 = vld [vmem:[%s4400_s3 + $0x20] ss:$36 sps:$4 sm:$0xff]  }
 0x1a1   :  { %2275 = vmatprep.subr.bf16.mxu0 %v3306_v40  ;;  %2312 = vmatprep.subr.bf16.mxu1 %v3309_v41  ;;  %v3367_v40 = vld [vmem:[%s4400_s3 + $0x530] ss:$36 sps:$4 sm:$0xff]   ;;  %v3368_v41 = vld [vmem:[%s4400_s3 + $0x728] ss:$36 sps:$4 sm:$0xff]  }
 0x1a4   :  { %2276 = vmatpush2.bf16.msra.mxu0 %v3304_v42  ;;  %2313 = vmatpush2.bf16.msra.mxu1 %v3307_v43  ;;  %v3369_v42 = vld [vmem:[%s4400_s3 + $0x4e8] ss:$36 sps:$4 sm:$0xff]   ;;  %v3370_v43 = vld [vmem:[%s4400_s3 + $0x6e0] ss:$36 sps:$4 sm:$0xff]  }
 0x1a5   :  { %2277 = vmatprep.subr.bf16.mxu0 %v3312_v44  ;;  %2314 = vmatprep.subr.bf16.mxu1 %v3315_v45  ;;  %v3371_v44 = vld [vmem:[%s4400_s3 + $0x4a0] ss:$36 sps:$4 sm:$0xff]  }
 0x1a8   :  { %2278 = vmatpush2.bf16.msra.mxu0 %v3310_v46  ;;  %2315 = vmatpush2.bf16.msra.mxu1 %v3313_v47 }
 0x1a9   :  { %2279 = vmatprep.subr.bf16.mxu0 %v3318_v48  ;;  %2316 = vmatprep.subr.bf16.mxu1 %v3321_v49 }
 0x1ac   :  { %2280 = vmatpush2.bf16.msra.mxu0 %v3316_v51  ;;  %2317 = vmatpush2.bf16.msra.mxu1 %v3319_v53 }
 0x1ad   :  { %2281 = vmatprep.subr.bf16.mxu0 %v3324_v54  ;;  %2318 = vmatprep.subr.bf16.mxu1 %v3327_v55 }
 0x1b0   :  { %2282 = vmatpush2.bf16.msra.mxu0 %v3322_v56  ;;  %2319 = vmatpush2.bf16.msra.mxu1 %v3325_v57  ;;  %v3399_v57 = vmov 0.0  }
 0x1b1   :  { %2283 = vmatprep.subr.bf16.mxu0 %v3330_v58  ;;  %2320 = vmatprep.subr.bf16.mxu1 %v3333_v59 }
 0x1b4   :  { %2284 = vmatpush2.bf16.msra.mxu0 %v3328_v61  ;;  %2321 = vmatpush2.bf16.msra.mxu1 %v3331_v62  ;;  %v2421_v61 = vld [vmem:[%s4399_s5 + $0x8] sm:$0xff] }
 0x1b5   :  { %2322 = vmatprep.subr.bf16.mxu1 %v3336_v0  ;;  %2866 = vmatprep.subr.bf16.mxu0 %v3337_v1  ;;  %v2504_v0 = vld [vmem:[%s4403_s7] sm:$0xff] }
 0x1b6   :  { %2431 = vperm.xlu1 %2943, %v2421_v61  }
 0x1b7   :  { %2286 = vmatmul.mubr.bf16.vlgmr.msra.gmra.mxu0 %v3684_v52  ;;  %v2041_v6 = vpop.f32.mrf.mxu0 }
 0x1b8   :  { %2323 = vmatpush2.bf16.msra.mxu1 %v3334_v2  ;;  %2867 = vmatpush3.bf16.msra.mxu0 %v3338_v3 }
 0x1b9   :  { %2367 = vmatprep.mubr.bf16.mxu0 %v3679_v50  ;;  %v2043_v9 = vpop.f32.mrf.mxu0  ;;  %2324 = vmatprep.subr.bf16.mxu1 %v3341_v4  ;;  %v3347_v50 = vld [vmem:[%s4400_s3 + $0x698] ss:$36 sps:$4 sm:$0xff]  }
 0x1ba   :  { %2868 = vmatprep.subr.bf16.mxu0 %v3342_v5  ;;  %2507 = vperm.xlu1 %2943, %v2504_v0  }
 0x1bb   :  { %v2045_v12 = vpop.f32.mrf.mxu0 }
 0x1bc   :  { %2325 = vmatpush2.bf16.msra.mxu1 %v3339_v7  ;;  %2869 = vmatpush3.bf16.msra.mxu0 %v3343_v8 }
 0x1bd   :  { %v2046_v14 = vpop.f32.mrf.mxu0  ;;  %2870 = vmatprep.subr.bf16.mxu0 %v3344_v10  ;;  %2888 = vmatprep.subr.bf16.mxu1 %v3345_v11 }
 0x1bf   :  { %2327 = vmatmul.mubr.bf16.vlgmr.msra.gmra.mxu1 %v3706_v63  ;;  %v2082_v17 = vpop.f32.mrf.mxu1 }
 0x1c0   :  { %v4304_v18 = vadd.f32 %v2082_v17, %v2041_v6  ;;  %2871 = vmatpush3.bf16.msra.mxu0 %v3346_v13  ;;  %2889 = vmatpush3.bf16.msra.mxu1 %v3347_v50 }
 0x1c1   :  { %2407 = vmatprep.mubr.bf16.mxu1 %v3698_v60  ;;  %v2084_v21 = vpop.f32.mrf.mxu1  ;;  %2872 = vmatprep.subr.bf16.mxu0 %v3348_v15  ;;  %v3354_v60 = vld [vmem:[%s4400_s3 + $0xf8] ss:$36 sps:$4 sm:$0xff]  }
 0x1c2   :  { %v4319_v24 = vadd.f32 %v2084_v21, %v2043_v9  ;;  %2890 = vmatprep.subr.bf16.mxu1 %v3349_v16 }
 0x1c3   :  { %v2086_v25 = vpop.f32.mrf.mxu1 }
 0x1c4   :  { %v2415_v26 = vpack.c.bf16 %v4319_v24, %v4304_v18  ;;  %2873 = vmatpush3.bf16.msra.mxu0 %v3350_v19  ;;  %2891 = vmatpush3.bf16.msra.mxu1 %v3351_v20 }
 0x1c5   :  { %v2087_v28 = vpop.f32.mrf.mxu1  ;;  %2874 = vmatprep.subr.bf16.mxu0 %v3352_v22  ;;  %2892 = vmatprep.subr.bf16.mxu1 %v3353_v23 }
 0x1c8   :  { %2875 = vmatpush3.bf16.msra.mxu0 %v3354_v60  ;;  %2893 = vmatpush3.bf16.msra.mxu1 %v3355_v27 }
 0x1c9   :  { %2876 = vmatprep.subr.bf16.mxu0 %v3356_v29  ;;  %2894 = vmatprep.subr.bf16.mxu1 %v3357_v30 }
 0x1cc   :  { %2877 = vmatpush3.bf16.msra.mxu0 %v3358_v31  ;;  %2895 = vmatpush3.bf16.msra.mxu1 %v3359_v32 }
 0x1cd   :  { %2878 = vmatprep.subr.bf16.mxu0 %v3360_v33  ;;  %2896 = vmatprep.subr.bf16.mxu1 %v3361_v34  ;;  %v3372_v33 = vld [vmem:[%s4402_s4] sm:$0xff]   ;;  %v2427_v34 = vpop.permute.xlu0 %2426 }
 0x1d0   :  { %2879 = vmatpush3.bf16.msra.mxu0 %v3362_v35  ;;  %2897 = vmatpush3.bf16.msra.mxu1 %v3363_v36 }
 0x1d1   :  { %2880 = vmatprep.subr.bf16.mxu0 %v3364_v37  ;;  %2898 = vmatprep.subr.bf16.mxu1 %v3365_v38 }
 0x1d4   :  { %2881 = vmatpush3.bf16.msra.mxu0 %v3366_v39  ;;  %2899 = vmatpush3.bf16.msra.mxu1 %v3367_v40 }
 0x1d5   :  { %2900 = vmatprep.subr.bf16.mxu1 %v3368_v41  ;;  %2918 = vmatprep.subr.bf16.mxu0 %v3399_v57 }
 0x1d7   :  { %2368 = vmatmul.mubr.bf16.vlgmr.msra.gmra.mxu0 %v3684_v52 }
 0x1d8   :  { %2901 = vmatpush3.bf16.msra.mxu1 %v3369_v42  ;;  %2928 = vmatprep.mubr.msk.bf16.mxu0 %vm3400_vm3, %v3399_v57 }
 0x1d9   :  { %2902 = vmatprep.subr.bf16.mxu1 %v3370_v43 }
 0x1dc   :  { %2903 = vmatpush3.bf16.msra.mxu1 %v3371_v44 }
 0x1dd   :  { %2932 = vmatprep.subr.bf16.mxu1 %v3399_v57 }
 0x1df   :  { %2408 = vmatmul.mubr.bf16.vlgmr.msra.gmra.mxu1 %v3706_v63 }
 0x1e0   :  { %2934 = vmatprep.mubr.msk.bf16.mxu1 %vm3400_vm3, %v3399_v57 }
 0x1f7   :  { %v2123_v45 = vpop.f32.mrf.mxu0 }
 0x1f9   :  { %v2125_v46 = vpop.f32.mrf.mxu0 }
 0x1fb   :  { %v2127_v47 = vpop.f32.mrf.mxu0 }
 0x1fd   :  { %v2128_v48 = vpop.f32.mrf.mxu0 }
 0x1ff   :  { %v2164_v49 = vpop.f32.mrf.mxu1 }
 0x200   :  { %v2165_v51 = vadd.f32 %v2164_v49, %v2123_v45 }
 0x201   :  { %v2166_v53 = vpop.f32.mrf.mxu1 }
 0x202   :  { %v2167_v54 = vadd.f32 %v2166_v53, %v2125_v46 }
 0x203   :  { %v2168_v55 = vpop.f32.mrf.mxu1 }
 0x204   :  { %v2416_v56 = vpack.c.bf16 %v2167_v54, %v2165_v51  ;;  %v2503_v51 = vld [vmem:[%s4404_s6] sm:$0xf] }
 0x205   :  { %v2169_v52 = vpop.f32.mrf.mxu1 }
 0x231   :  { %v2432_v39 = vpop.permute.xlu1 %2431 }
 0x235   :  { %v2508_v53 = vpop.permute.xlu1 %2507 }
 0x237   :  { %v2205_v58 = vpop.f32.mrf.mxu0 }
 0x239   :  { %v2207_v59 = vpop.f32.mrf.mxu0 }
 0x23b   :  { %v2209_v63 = vpop.f32.mrf.mxu0 }
 0x23d   :  { %v2210_v62 = vpop.f32.mrf.mxu0 }
 0x23f   :  { %v2246_v1 = vpop.f32.mrf.mxu1 }
 0x240   :  { %v2247_v2 = vadd.f32 %v2246_v1, %v2205_v58 }
 0x241   :  { %v2248_v3 = vpop.f32.mrf.mxu1 }
 0x242   :  { %v2249_v4 = vadd.f32 %v2248_v3, %v2207_v59 }
 0x243   :  { %v2250_v5 = vpop.f32.mrf.mxu1 }
 0x244   :  { %v2417_v6 = vpack.c.bf16 %v2249_v4, %v2247_v2 }
 0x245   :  { %v2251_v7 = vpop.f32.mrf.mxu1 }
 0x277   :  { %v2287_v8 = vpop.f32.mrf.mxu0 }
 0x279   :  { %v2289_v9 = vpop.f32.mrf.mxu0 }
 0x27b   :  { %v2291_v10 = vpop.f32.mrf.mxu0 }
 0x27d   :  { %v2292_v11 = vpop.f32.mrf.mxu0 }
 0x27f   :  { %v2328_v12 = vpop.f32.mrf.mxu1 }
 0x280   :  { %v2329_v31 = vadd.f32 %v2328_v12, %v2287_v8 }
 0x281   :  { %v2330_v13 = vpop.f32.mrf.mxu1 }
 0x282   :  { %v2331_v29 = vadd.f32 %v2330_v13, %v2289_v9 }
 0x283   :  { %v2332_v50 = vpop.f32.mrf.mxu1 }
 0x284   :  { %v2418_v32 = vpack.c.bf16 %v2331_v29, %v2329_v31 }
 0x285   :  { %v2333_v14 = vpop.f32.mrf.mxu1 }
 0x297   :  { %v2882_v15 = vpop.f32.mrf.mxu0 }
 0x299   :  { %v2883_v16 = vpop.f32.mrf.mxu0 }
 0x29a   :  { %v2884_v22 = vadd.f32 %v2883_v16, %v2882_v15 }
 0x29b   :  { %v2885_v17 = vpop.f32.mrf.mxu0 }
 0x29d   :  { %v2886_v19 = vpop.f32.mrf.mxu0 }
 0x29f   :  { %v2904_v20 = vpop.f32.mrf.mxu1 }
 0x2a1   :  { %v2905_v21 = vpop.f32.mrf.mxu1 }
 0x2a2   :  { %v2906_v23 = vadd.f32 %v2905_v21, %v2904_v20 }
 0x2a3   :  { %v2907_v25 = vpop.f32.mrf.mxu1 }
 0x2a4   :  { %v2410_v60 = vadd.f32 %v2906_v23, %v2884_v22 }
 0x2a5   :  { %v2908_v27 = vpop.f32.mrf.mxu1 }
 0x2a6   :  { %v2419_v28 = vpack.c.bf16 %v2410_v60, %v2410_v60 }
 0x2a8   :  { %v2445_v30 = vsel %vm2443_vm4, %v2419_v28, 0 }
 0x2a9   :  { %2919 = vmatpush3.bf16.msra.mxu0 %v2445_v30 }
 0x2aa   :  { %2920 = vmatprep.subr.bf16.mxu0 %v3399_v57 }
 0x2ad   :  { %2921 = vmatpush3.bf16.msra.mxu0 %v2418_v32 }
 0x2ae   :  { %2922 = vmatprep.subr.bf16.mxu0 %v3399_v57 }
 0x2b1   :  { %2923 = vmatpush3.bf16.msra.mxu0 %v2417_v6 }
 0x2b2   :  { %2924 = vmatprep.subr.bf16.mxu0 %v3399_v57 }
 0x2b5   :  { %2925 = vmatpush3.bf16.msra.mxu0 %v2416_v56 }
 0x2b6   :  { %2926 = vmatprep.subr.bf16.mxu0 %v3399_v57 }
 0x2b9   :  { %2927 = vmatpush3.bf16.msra.mxu0 %v2415_v26 }
 0x2bc   :  { %2929 = vmatmul.mubr.msk.bf16.vlgmr.msra.gmra.mxu0 %vm2439_vm5, %v3372_v33 }
 0x37c   :  { %v2481_v35 = vpop.f32.mrf.mxu0 }
 0x37d   :  { %v2482_v36 = vadd.f32 %v2481_v35, %v2427_v34 }
 0x37e   :  { %v2930_v37 = vpop.f32.mrf.mxu0 }
 0x37f   :  { %v2863_v38 = vmul.f32 -1.442695, %v2482_v36 }
 0x380   :  { %v2484_v40 = vpop.f32.mrf.mxu0 }
 0x381   :  { %3389 = vpow2.f32 %v2863_v38  ;;  %v2485_v41 = vadd.f32 %v2484_v40, %v2432_v39 }
 0x382   :  { %v2931_v42 = vpop.f32.mrf.mxu0 }
 0x383   :  { %v2864_v43 = vmul.f32 -1.442695, %v2485_v41 }
 0x385   :  { %3391 = vpow2.f32 %v2864_v43 }
 0x38e   :  { %v3390_v44 = vpop.eup %3389 }
 0x38f   :  { %v2494_v45 = vadd.f32 1.0, %v3390_v44 }
 0x391   :  { %3393 = vrcp.f32 %v2494_v45 }
 0x392   :  { %v3392_v46 = vpop.eup %3391 }
 0x393   :  { %v2495_v18 = vadd.f32 1.0, %v3392_v46 }
 0x395   :  { %3395 = vrcp.f32 %v2495_v18 }
 0x39e   :  { %v3394_v24 = vpop.eup %3393 }
 0x39f   :  { %v2500_v47 = vmul.f32 %v3394_v24, %v2482_v36 }
 0x3a2   :  { %v3396_v26 = vpop.eup %3395 }
 0x3a3   :  { %v2501_v48 = vmul.f32 %v3396_v26, %v2485_v41 }
 0x3a5   :  { %v2502_v49 = vpack.c.bf16 %v2501_v48, %v2500_v47 }
 0x3a7   :  { %2933 = vmatpush3.bf16.msra.mxu1 %v2502_v49 }
 0x3aa   :  { %2935 = vmatmul.mubr.msk.bf16.vlgmr.msra.gmra.mxu1 %vm2510_vm6, %v2503_v51 }
 0x46a   :  { %v2548_v54 = vpop.f32.mrf.mxu1 }
 0x46b   :  { %v2549_v55 = vadd.f32 %v2548_v54, %v2508_v53 }
 0x46c   :  { %v2936_v56 = vpop.f32.mrf.mxu1 }
 0x46d   :  { %2554 = vst [vmem:[%s4405_s8] sm:$0xff] %v2549_v55 }
 0x46e   :  { %v2551_v52 = vpop.f32.mrf.mxu1 }
 0x470   :  { %v2937_v57 = vpop.f32.mrf.mxu1 }

</bundles_post_ra>
